<compile_context>
chip_gen: v7x
topology: tpu7x:2x2x1
jax: 0.10.0
libtpu: 0.0.40
codegen_flags: <defaults>
</compile_context>

<pallas_src>
import functools

import jax
import jax.numpy as jnp
from jax.experimental import pallas as pl
from jax.experimental.pallas import tpu as pltpu


def lstm_kernel(len_ref, tmax_ref, xg_ref, b2_ref, wout_ref, bout_ref,
                whh1_hbm, w2_hbm,
                out_ref,
                whh1_v, w2_v, hx1, cx1, hx2, cx2, sel):
    c = pl.program_id(0)
    n_chunks = pl.num_programs(0)
    Tc, B, G = xg_ref.shape          # G == 4 * H
    H = hx1.shape[1]

    @pl.when(c == 0)
    def _init():
        # Recurrent weights: copied into VMEM once, resident (single-buffered)
        # for the whole grid.
        pltpu.sync_copy(whh1_hbm, whh1_v)
        pltpu.sync_copy(w2_hbm, w2_v)
        hx1[...] = jnp.zeros_like(hx1)
        cx1[...] = jnp.zeros_like(cx1)
        hx2[...] = jnp.zeros_like(hx2)
        cx2[...] = jnp.zeros_like(cx2)
        sel[...] = jnp.zeros_like(sel)

    # Skip whole chunks that lie beyond the longest requested time index.
    @pl.when(c * Tc <= tmax_ref[0])
    def _chunk():
        whh1_w = whh1_v[...]                 # (H, 4H)  bf16
        w2_w = w2_v[...]                     # (2H, 4H) bf16, rows = [Wih2 ; Whh2]
        b2 = b2_ref[...]                     # (1, 4H)  f32
        len_col = len_ref[...]               # (B, 1)   int32

        # Lane mask selecting the "g" gate block [2H, 3H): one full-width sigmoid
        # + one full-width tanh + a select, no per-gate sub-vreg transcendentals.
        lane = jax.lax.broadcasted_iota(jnp.int32, (B, G), 1)
        is_g = (lane >= 2 * H) & (lane < 3 * H)

        def cell(gates, c_prev):
            act = jnp.where(is_g, jnp.tanh(gates), jax.nn.sigmoid(gates))
            i_g = act[:, 0:H]
            f_g = act[:, H:2 * H]
            g_g = act[:, 2 * H:3 * H]
            o_g = act[:, 3 * H:4 * H]
            c_new = f_g * c_prev + i_g * g_g
            h_new = jnp.tanh(o_g * jnp.tanh(c_new))   # module's extra F.tanh
            return h_new, c_new

        def step(i, carry):
            h1, c1, h2, c2, s = carry
            t = c * Tc + i
            # Layer 1: x @ Wih1 + b1 was hoisted into the pre-gates xg; only the
            # recurrent matmul remains per step.
            g1 = xg_ref[i] + jnp.dot(h1.astype(whh1_w.dtype), whh1_w,
                                     preferred_element_type=jnp.float32)
            h1, c1 = cell(g1, c1)
            # Layer 2: fused [h1 ; h2] @ [Wih2 ; Whh2] -> a single MXU matmul.
            hin = jnp.concatenate([h1, h2], axis=1).astype(w2_w.dtype)
            g2 = jnp.dot(hin, w2_w, preferred_element_type=jnp.float32) + b2
            h2, c2 = cell(g2, c2)
            # outputs[length[b], b] selection, done online.
            s = jnp.where(len_col == t, h2, s)
            return h1, c1, h2, c2, s

        carry = (hx1[...], cx1[...], hx2[...], cx2[...], sel[...])
        h1, c1, h2, c2, s = jax.lax.fori_loop(0, Tc, step, carry, unroll=True)
        hx1[...] = h1
        cx1[...] = c1
        hx2[...] = h2
        cx2[...] = c2
        sel[...] = s

    @pl.when(c == n_chunks - 1)
    def _finalize():
        w_out = wout_ref[...]
        logits = (jnp.dot(sel[...].astype(w_out.dtype), w_out,
                          preferred_element_type=jnp.float32) + bout_ref[...])
        m = jnp.max(logits, axis=1, keepdims=True)
        lse = jnp.log(jnp.sum(jnp.exp(logits - m), axis=1, keepdims=True)) + m
        out_ref[...] = logits - lse


@functools.partial(jax.jit, static_argnames=("time_chunk",))
def lstm_forward(x, length, params, time_chunk=8):
    T, B, I = x.shape
    wih1, whh1, b1, w2, b2, wout, bout = params
    H = whh1.shape[0]
    G = 4 * H
    O = wout.shape[1]

    # Hoisted non-recurrent input projection of layer 1: one big GEMM with
    # M = T*B (instead of T tiny M=B matmuls inside the kernel), bias folded in.
    xg = (jnp.dot(x.reshape(T * B, I).astype(jnp.bfloat16), wih1,
                  preferred_element_type=jnp.float32).reshape(T, B, G) + b1)

    Tc = max(1, min(time_chunk, T))
    num_chunks = pl.cdiv(T, Tc)
    T_pad = num_chunks * Tc
    if T_pad != T:                       # padded steps are never selected (length < T)
        xg = jnp.pad(xg, ((0, T_pad - T), (0, 0), (0, 0)))

    length = length.astype(jnp.int32)
    tmax = jnp.max(length).reshape(1).astype(jnp.int32)

    return pl.pallas_call(
        lstm_kernel,
        out_shape=jax.ShapeDtypeStruct((B, O), jnp.float32),
        grid=(num_chunks,),
        in_specs=[
            pl.BlockSpec((B, 1), lambda c: (0, 0)),                # length (VMEM)
            pl.BlockSpec(memory_space=pltpu.MemorySpace.SMEM),     # max(length) scalar
            pl.BlockSpec((Tc, B, G), lambda c: (c, 0, 0)),         # pre-gates chunk
            pl.BlockSpec((1, G), lambda c: (0, 0)),                # b2
            pl.BlockSpec((H, O), lambda c: (0, 0)),                # W_out
            pl.BlockSpec((1, O), lambda c: (0, 0)),                # b_out
            pl.BlockSpec(memory_space=pl.ANY),                     # Whh1 (HBM)
            pl.BlockSpec(memory_space=pl.ANY),                     # fused W2 (HBM)
        ],
        out_specs=pl.BlockSpec((B, O), lambda c: (0, 0)),
        scratch_shapes=[
            pltpu.VMEM((H, G), whh1.dtype),        # Whh1 resident
            pltpu.VMEM((2 * H, G), w2.dtype),      # [Wih2 ; Whh2] resident
            pltpu.VMEM((B, H), jnp.float32),       # hx1
            pltpu.VMEM((B, H), jnp.float32),       # cx1
            pltpu.VMEM((B, H), jnp.float32),       # hx2
            pltpu.VMEM((B, H), jnp.float32),       # cx2
            pltpu.VMEM((B, H), jnp.float32),       # sel (outputs[length[b], b])
        ],
        compiler_params=pltpu.CompilerParams(
            dimension_semantics=("arbitrary",)),
    )(length, tmax, xg, b2, wout, bout, whh1, w2)


def make_params(key, in_size, hidden, out_size, w_dtype=jnp.bfloat16):
    ks = jax.random.split(key, 10)
    s = 1.0 / jnp.sqrt(hidden)
    u = lambda k, shape: jax.random.uniform(k, shape, jnp.float32, -s, s)
    # PyTorch LSTMCell stores (4H, in)/(4H, H); keep transposed for (B,K)@(K,4H) matmuls.
    wih1 = u(ks[0], (in_size, 4 * hidden)).astype(w_dtype)
    whh1 = u(ks[1], (hidden, 4 * hidden)).astype(w_dtype)
    b1 = u(ks[2], (1, 4 * hidden)) + u(ks[3], (1, 4 * hidden))       # b_ih + b_hh
    wih2 = u(ks[4], (hidden, 4 * hidden))
    whh2 = u(ks[5], (hidden, 4 * hidden))
    w2 = jnp.concatenate([wih2, whh2], axis=0).astype(w_dtype)        # rows: [ih ; hh]
    b2 = u(ks[6], (1, 4 * hidden)) + u(ks[7], (1, 4 * hidden))
    wout = u(ks[8], (hidden, out_size)).astype(w_dtype)
    bout = u(ks[9], (1, out_size))
    return (wih1, whh1, b1, w2, b2, wout, bout)


def reference_forward(x, length, params):
    """Pure-JAX reference mirroring the PyTorch forward (eval mode) with the same
    bf16-weight / f32-accumulate quantization as the kernel."""
    wih1, whh1, b1, w2, b2, wout, bout = params
    T, B, _ = x.shape
    H = whh1.shape[0]
    mm = lambda a, w: jnp.dot(a.astype(jnp.bfloat16), w,
                              preferred_element_type=jnp.float32)
    hx1 = cx1 = hx2 = cx2 = jnp.zeros((B, H), jnp.float32)
    outs = []
    for t in range(T):
        g1 = mm(x[t], wih1) + mm(hx1, whh1) + b1
        i1, f1, gg1, o1 = jnp.split(g1, 4, axis=1)
        cx1 = jax.nn.sigmoid(f1) * cx1 + jax.nn.sigmoid(i1) * jnp.tanh(gg1)
        hx1 = jnp.tanh(jax.nn.sigmoid(o1) * jnp.tanh(cx1))
        g2 = mm(jnp.concatenate([hx1, hx2], axis=1), w2) + b2
        i2, f2, gg2, o2 = jnp.split(g2, 4, axis=1)
        cx2 = jax.nn.sigmoid(f2) * cx2 + jax.nn.sigmoid(i2) * jnp.tanh(gg2)
        hx2 = jnp.tanh(jax.nn.sigmoid(o2) * jnp.tanh(cx2))
        outs.append(hx2)
    outs = jnp.stack(outs, axis=0)
    sel = outs[length[:, 0], jnp.arange(B)]
    logits = mm(sel, wout) + bout
    return jax.nn.log_softmax(logits, axis=1)


if __name__ == "__main__":
    T, B, IN, H, OUT = 8, 4, 16, 32, 8
    key = jax.random.PRNGKey(0)
    kx, klen, kp = jax.random.split(key, 3)

    x = jax.random.normal(kx, (T, B, IN), jnp.float32)
    length = jax.random.randint(klen, (B, 1), 0, T, jnp.int32)
    params = make_params(kp, IN, H, OUT)

    out = lstm_forward(x, length, params)
    jax.block_until_ready(out)

    ref = reference_forward(x, length, params)
    # tolerance accounts for bf16 matmul inputs (f32 accumulate) on both sides
    assert jnp.allclose(out, ref, atol=5e-3, rtol=5e-3), "mismatch vs reference"
    print("KERNEL_OK")
</pallas_src>

<mosaic_0001>
module attributes {stable_mosaic.version = 11 : i64} {
  func.func @lstm_kernel(%arg0: i32, %arg1: memref<4x1xi32, #tpu.memory_space<vmem>>, %arg2: memref<1xi32, #tpu.memory_space<smem>>, %arg3: memref<8x4x128xf32, #tpu.memory_space<vmem>>, %arg4: memref<1x128xf32, #tpu.memory_space<vmem>>, %arg5: memref<32x8xbf16, #tpu.memory_space<vmem>>, %arg6: memref<1x8xf32, #tpu.memory_space<vmem>>, %arg7: memref<32x128xbf16, #tpu.memory_space<any>>, %arg8: memref<64x128xbf16, #tpu.memory_space<any>>, %arg9: memref<4x8xf32, #tpu.memory_space<vmem>>, %arg10: memref<32x128xbf16, #tpu.memory_space<vmem>>, %arg11: memref<64x128xbf16, #tpu.memory_space<vmem>>, %arg12: memref<4x32xf32, #tpu.memory_space<vmem>>, %arg13: memref<4x32xf32, #tpu.memory_space<vmem>>, %arg14: memref<4x32xf32, #tpu.memory_space<vmem>>, %arg15: memref<4x32xf32, #tpu.memory_space<vmem>>, %arg16: memref<4x32xf32, #tpu.memory_space<vmem>>) attributes {dimension_semantics = [#tpu.dimension_semantics<arbitrary>], iteration_bounds = array<i64: 1>, scalar_prefetch = 0 : i64, scratch_operands = 7 : i64, tpu.core_type = #tpu.core_type<tc>, window_params = [{pipeline_mode = #tpu.pipeline_mode<synchronous>, transform_indices = @transform_0, window_bounds = array<i64: 4, 1>}, {transform_indices = @transform_1, window_bounds = array<i64: 1>}, {transform_indices = @transform_2, window_bounds = array<i64: 8, 4, 128>}, {pipeline_mode = #tpu.pipeline_mode<synchronous>, transform_indices = @transform_3, window_bounds = array<i64: 1, 128>}, {pipeline_mode = #tpu.pipeline_mode<synchronous>, transform_indices = @transform_4, window_bounds = array<i64: 32, 8>}, {pipeline_mode = #tpu.pipeline_mode<synchronous>, transform_indices = @transform_5, window_bounds = array<i64: 1, 8>}, {}, {}, {pipeline_mode = #tpu.pipeline_mode<synchronous>, transform_indices = @transform_8, window_bounds = array<i64: 4, 8>}]} {
    %c0_i32 = arith.constant 0 : i32
    %0 = arith.cmpi eq, %arg0, %c0_i32 : i32
    %1 = arith.extui %0 : i1 to i32
    %c0_i32_0 = arith.constant 0 : i32
    %2 = arith.cmpi ne, %1, %c0_i32_0 : i32
    scf.if %2 {
      "tpu.region"() ({
        %21 = tpu.sem_alloc : memref<!tpu.dma_semaphore, #tpu.memory_space<semaphore_mem>>
        tpu.enqueue_dma source(%arg7 : memref<32x128xbf16, #tpu.memory_space<any>>) target(%arg10 : memref<32x128xbf16, #tpu.memory_space<vmem>>) target_semaphore(%21 : memref<!tpu.dma_semaphore, #tpu.memory_space<semaphore_mem>>)
        tpu.wait_dma2 semaphore(%21 : memref<!tpu.dma_semaphore, #tpu.memory_space<semaphore_mem>>) src(%arg7 : memref<32x128xbf16, #tpu.memory_space<any>>) dst(%arg10 : memref<32x128xbf16, #tpu.memory_space<vmem>>)
        tpu.yield
      }) : () -> ()
      "tpu.region"() ({
        %21 = tpu.sem_alloc : memref<!tpu.dma_semaphore, #tpu.memory_space<semaphore_mem>>
        tpu.enqueue_dma source(%arg8 : memref<64x128xbf16, #tpu.memory_space<any>>) target(%arg11 : memref<64x128xbf16, #tpu.memory_space<vmem>>) target_semaphore(%21 : memref<!tpu.dma_semaphore, #tpu.memory_space<semaphore_mem>>)
        tpu.wait_dma2 semaphore(%21 : memref<!tpu.dma_semaphore, #tpu.memory_space<semaphore_mem>>) src(%arg8 : memref<64x128xbf16, #tpu.memory_space<any>>) dst(%arg11 : memref<64x128xbf16, #tpu.memory_space<vmem>>)
        tpu.yield
      }) : () -> ()
      %cst = arith.constant 0.000000e+00 : f32
      %11 = vector.broadcast %cst : f32 to vector<4x32xf32>
      %c0_4 = arith.constant 0 : index
      %c0_5 = arith.constant 0 : index
      %12 = vector.load %arg12[%c0_4, %c0_5] : memref<4x32xf32, #tpu.memory_space<vmem>>, vector<4x32xf32>
      tpu.vector_store %arg12[%c0_4, %c0_5], %11 {strides = array<i32>} : memref<4x32xf32, #tpu.memory_space<vmem>>, vector<4x32xf32>,
      %cst_6 = arith.constant 0.000000e+00 : f32
      %13 = vector.broadcast %cst_6 : f32 to vector<4x32xf32>
      %c0_7 = arith.constant 0 : index
      %c0_8 = arith.constant 0 : index
      %14 = vector.load %arg13[%c0_7, %c0_8] : memref<4x32xf32, #tpu.memory_space<vmem>>, vector<4x32xf32>
      tpu.vector_store %arg13[%c0_7, %c0_8], %13 {strides = array<i32>} : memref<4x32xf32, #tpu.memory_space<vmem>>, vector<4x32xf32>,
      %cst_9 = arith.constant 0.000000e+00 : f32
      %15 = vector.broadcast %cst_9 : f32 to vector<4x32xf32>
      %c0_10 = arith.constant 0 : index
      %c0_11 = arith.constant 0 : index
      %16 = vector.load %arg14[%c0_10, %c0_11] : memref<4x32xf32, #tpu.memory_space<vmem>>, vector<4x32xf32>
      tpu.vector_store %arg14[%c0_10, %c0_11], %15 {strides = array<i32>} : memref<4x32xf32, #tpu.memory_space<vmem>>, vector<4x32xf32>,
      %cst_12 = arith.constant 0.000000e+00 : f32
      %17 = vector.broadcast %cst_12 : f32 to vector<4x32xf32>
      %c0_13 = arith.constant 0 : index
      %c0_14 = arith.constant 0 : index
      %18 = vector.load %arg15[%c0_13, %c0_14] : memref<4x32xf32, #tpu.memory_space<vmem>>, vector<4x32xf32>
      tpu.vector_store %arg15[%c0_13, %c0_14], %17 {strides = array<i32>} : memref<4x32xf32, #tpu.memory_space<vmem>>, vector<4x32xf32>,
      %cst_15 = arith.constant 0.000000e+00 : f32
      %19 = vector.broadcast %cst_15 : f32 to vector<4x32xf32>
      %c0_16 = arith.constant 0 : index
      %c0_17 = arith.constant 0 : index
      %20 = vector.load %arg16[%c0_16, %c0_17] : memref<4x32xf32, #tpu.memory_space<vmem>>, vector<4x32xf32>
      tpu.vector_store %arg16[%c0_16, %c0_17], %19 {strides = array<i32>} : memref<4x32xf32, #tpu.memory_space<vmem>>, vector<4x32xf32>,
    } else {
    }
    %c8_i32 = arith.constant 8 : i32
    %3 = arith.muli %arg0, %c8_i32 : i32
    %c0 = arith.constant 0 : index
    %4 = memref.load %arg2[%c0] : memref<1xi32, #tpu.memory_space<smem>>
    %5 = arith.cmpi sle, %3, %4 : i32
    %6 = arith.extui %5 : i1 to i32
    %c0_i32_1 = arith.constant 0 : i32
    %7 = arith.cmpi ne, %6, %c0_i32_1 : i32
    scf.if %7 {
      %c0_4 = arith.constant 0 : index
      %c0_5 = arith.constant 0 : index
      %11 = vector.load %arg10[%c0_4, %c0_5] : memref<32x128xbf16, #tpu.memory_space<vmem>>, vector<32x128xbf16>
      %c0_6 = arith.constant 0 : index
      %c0_7 = arith.constant 0 : index
      %12 = vector.load %arg11[%c0_6, %c0_7] : memref<64x128xbf16, #tpu.memory_space<vmem>>, vector<64x128xbf16>
      %c0_8 = arith.constant 0 : index
      %c0_9 = arith.constant 0 : index
      %13 = vector.load %arg4[%c0_8, %c0_9] : memref<1x128xf32, #tpu.memory_space<vmem>>, vector<1x128xf32>
      %c0_10 = arith.constant 0 : index
      %c0_11 = arith.constant 0 : index
      %14 = vector.load %arg1[%c0_10, %c0_11] : memref<4x1xi32, #tpu.memory_space<vmem>>, vector<4x1xi32>
      %15 = tpu.iota {dimensions = array<i32: 1>} : vector<4x128xi32>
      %c64_i32 = arith.constant 64 : i32
      %16 = vector.broadcast %c64_i32 : i32 to vector<4x128xi32>
      %17 = arith.cmpi sge, %15, %16 : vector<4x128xi32>
      %c96_i32 = arith.constant 96 : i32
      %18 = vector.broadcast %c96_i32 : i32 to vector<4x128xi32>
      %19 = arith.cmpi slt, %15, %18 : vector<4x128xi32>
      %20 = arith.andi %17, %19 : vector<4x128xi1>
      %c0_12 = arith.constant 0 : index
      %c0_13 = arith.constant 0 : index
      %21 = vector.load %arg12[%c0_12, %c0_13] : memref<4x32xf32, #tpu.memory_space<vmem>>, vector<4x32xf32>
      %c0_14 = arith.constant 0 : index
      %c0_15 = arith.constant 0 : index
      %22 = vector.load %arg13[%c0_14, %c0_15] : memref<4x32xf32, #tpu.memory_space<vmem>>, vector<4x32xf32>
      %c0_16 = arith.constant 0 : index
      %c0_17 = arith.constant 0 : index
      %23 = vector.load %arg14[%c0_16, %c0_17] : memref<4x32xf32, #tpu.memory_space<vmem>>, vector<4x32xf32>
      %c0_18 = arith.constant 0 : index
      %c0_19 = arith.constant 0 : index
      %24 = vector.load %arg15[%c0_18, %c0_19] : memref<4x32xf32, #tpu.memory_space<vmem>>, vector<4x32xf32>
      %c0_20 = arith.constant 0 : index
      %c0_21 = arith.constant 0 : index
      %25 = vector.load %arg16[%c0_20, %c0_21] : memref<4x32xf32, #tpu.memory_space<vmem>>, vector<4x32xf32>
      %c0_i32_22 = arith.constant 0 : i32
      %c8_i32_23 = arith.constant 8 : i32
      %26 = arith.muli %arg0, %c8_i32_23 : i32
      %27 = arith.addi %26, %c0_i32_22 : i32
      %28 = arith.index_cast %c0_i32_22 : i32 to index
      %c0_24 = arith.constant 0 : index
      %c0_25 = arith.constant 0 : index
      %29 = vector.load %arg3[%28, %c0_24, %c0_25] : memref<8x4x128xf32, #tpu.memory_space<vmem>>, vector<1x4x128xf32>
      %30 = vector.shape_cast %29 : vector<1x4x128xf32> to vector<4x128xf32>
      %31 = arith.truncf %21 : vector<4x32xf32> to vector<4x32xbf16>
      %cst = arith.constant dense<0.000000e+00> : vector<4x128xf32>
      %32 = tpu.matmul %31, %11, %cst {dimension_numbers = #tpu.dot_dimension_numbers<[1], [0], [0], [1], [0, 0, 1, 1], [], []>} : vector<4x32xbf16>, vector<32x128xbf16>, vector<4x128xf32> -> vector<4x128xf32>
      %33 = arith.addf %30, %32 : vector<4x128xf32>
      %34 = math.tanh %33 : vector<4x128xf32>
      %35 = arith.negf %33 : vector<4x128xf32>
      %36 = math.exp %35 : vector<4x128xf32>
      %cst_26 = arith.constant 1.000000e+00 : f32
      %37 = vector.broadcast %cst_26 : f32 to vector<4x128xf32>
      %38 = arith.addf %37, %36 : vector<4x128xf32>
      %39 = arith.divf %37, %38 : vector<4x128xf32>
      %40 = arith.select %20, %34, %39 : vector<4x128xi1>, vector<4x128xf32>
      %41 = vector.extract_strided_slice %40 {offsets = [0, 0], sizes = [4, 32], strides = [1, 1]} : vector<4x128xf32> to vector<4x32xf32>
      %42 = vector.extract_strided_slice %40 {offsets = [0, 32], sizes = [4, 32], strides = [1, 1]} : vector<4x128xf32> to vector<4x32xf32>
      %43 = vector.extract_strided_slice %40 {offsets = [0, 64], sizes = [4, 32], strides = [1, 1]} : vector<4x128xf32> to vector<4x32xf32>
      %44 = vector.extract_strided_slice %40 {offsets = [0, 96], sizes = [4, 32], strides = [1, 1]} : vector<4x128xf32> to vector<4x32xf32>
      %45 = arith.mulf %42, %22 : vector<4x32xf32>
      %46 = arith.mulf %41, %43 : vector<4x32xf32>
      %47 = arith.addf %45, %46 : vector<4x32xf32>
      %48 = math.tanh %47 : vector<4x32xf32>
      %49 = arith.mulf %44, %48 : vector<4x32xf32>
      %50 = math.tanh %49 : vector<4x32xf32>
      %51 = tpu.concatenate %50, %23 in 1 : vector<4x32xf32>, vector<4x32xf32> -> vector<4x64xf32>
      %52 = arith.truncf %51 : vector<4x64xf32> to vector<4x64xbf16>
      %cst_27 = arith.constant dense<0.000000e+00> : vector<4x128xf32>
      %53 = tpu.matmul %52, %12, %cst_27 {dimension_numbers = #tpu.dot_dimension_numbers<[1], [0], [0], [1], [0, 0, 1, 1], [], []>} : vector<4x64xbf16>, vector<64x128xbf16>, vector<4x128xf32> -> vector<4x128xf32>
      %54 = vector.broadcast %13 : vector<1x128xf32> to vector<4x128xf32>
      %55 = arith.addf %53, %54 : vector<4x128xf32>
      %56 = math.tanh %55 : vector<4x128xf32>
      %57 = arith.negf %55 : vector<4x128xf32>
      %58 = math.exp %57 : vector<4x128xf32>
      %cst_28 = arith.constant 1.000000e+00 : f32
      %59 = vector.broadcast %cst_28 : f32 to vector<4x128xf32>
      %60 = arith.addf %59, %58 : vector<4x128xf32>
      %61 = arith.divf %59, %60 : vector<4x128xf32>
      %62 = arith.select %20, %56, %61 : vector<4x128xi1>, vector<4x128xf32>
      %63 = vector.extract_strided_slice %62 {offsets = [0, 0], sizes = [4, 32], strides = [1, 1]} : vector<4x128xf32> to vector<4x32xf32>
      %64 = vector.extract_strided_slice %62 {offsets = [0, 32], sizes = [4, 32], strides = [1, 1]} : vector<4x128xf32> to vector<4x32xf32>
      %65 = vector.extract_strided_slice %62 {offsets = [0, 64], sizes = [4, 32], strides = [1, 1]} : vector<4x128xf32> to vector<4x32xf32>
      %66 = vector.extract_strided_slice %62 {offsets = [0, 96], sizes = [4, 32], strides = [1, 1]} : vector<4x128xf32> to vector<4x32xf32>
      %67 = arith.mulf %64, %24 : vector<4x32xf32>
      %68 = arith.mulf %63, %65 : vector<4x32xf32>
      %69 = arith.addf %67, %68 : vector<4x32xf32>
      %70 = math.tanh %69 : vector<4x32xf32>
      %71 = arith.mulf %66, %70 : vector<4x32xf32>
      %72 = math.tanh %71 : vector<4x32xf32>
      %73 = vector.broadcast %27 : i32 to vector<4x1xi32>
      %74 = arith.cmpi eq, %14, %73 : vector<4x1xi32>
      %75 = vector.shape_cast %74 : vector<4x1xi1> to vector<4x1xi1>
      %76 = vector.broadcast %75 : vector<4x1xi1> to vector<4x32xi1>
      %77 = arith.select %76, %72, %25 : vector<4x32xi1>, vector<4x32xf32>
      %c1_i32 = arith.constant 1 : i32
      %c8_i32_29 = arith.constant 8 : i32
      %78 = arith.muli %arg0, %c8_i32_29 : i32
      %79 = arith.addi %78, %c1_i32 : i32
      %80 = arith.index_cast %c1_i32 : i32 to index
      %c0_30 = arith.constant 0 : index
      %c0_31 = arith.constant 0 : index
      %81 = vector.load %arg3[%80, %c0_30, %c0_31] : memref<8x4x128xf32, #tpu.memory_space<vmem>>, vector<1x4x128xf32>
      %82 = vector.shape_cast %81 : vector<1x4x128xf32> to vector<4x128xf32>
      %83 = arith.truncf %50 : vector<4x32xf32> to vector<4x32xbf16>
      %cst_32 = arith.constant dense<0.000000e+00> : vector<4x128xf32>
      %84 = tpu.matmul %83, %11, %cst_32 {dimension_numbers = #tpu.dot_dimension_numbers<[1], [0], [0], [1], [0, 0, 1, 1], [], []>} : vector<4x32xbf16>, vector<32x128xbf16>, vector<4x128xf32> -> vector<4x128xf32>
      %85 = arith.addf %82, %84 : vector<4x128xf32>
      %86 = math.tanh %85 : vector<4x128xf32>
      %87 = arith.negf %85 : vector<4x128xf32>
      %88 = math.exp %87 : vector<4x128xf32>
      %cst_33 = arith.constant 1.000000e+00 : f32
      %89 = vector.broadcast %cst_33 : f32 to vector<4x128xf32>
      %90 = arith.addf %89, %88 : vector<4x128xf32>
      %91 = arith.divf %89, %90 : vector<4x128xf32>
      %92 = arith.select %20, %86, %91 : vector<4x128xi1>, vector<4x128xf32>
      %93 = vector.extract_strided_slice %92 {offsets = [0, 0], sizes = [4, 32], strides = [1, 1]} : vector<4x128xf32> to vector<4x32xf32>
      %94 = vector.extract_strided_slice %92 {offsets = [0, 32], sizes = [4, 32], strides = [1, 1]} : vector<4x128xf32> to vector<4x32xf32>
      %95 = vector.extract_strided_slice %92 {offsets = [0, 64], sizes = [4, 32], strides = [1, 1]} : vector<4x128xf32> to vector<4x32xf32>
      %96 = vector.extract_strided_slice %92 {offsets = [0, 96], sizes = [4, 32], strides = [1, 1]} : vector<4x128xf32> to vector<4x32xf32>
      %97 = arith.mulf %94, %47 : vector<4x32xf32>
      %98 = arith.mulf %93, %95 : vector<4x32xf32>
      %99 = arith.addf %97, %98 : vector<4x32xf32>
      %100 = math.tanh %99 : vector<4x32xf32>
      %101 = arith.mulf %96, %100 : vector<4x32xf32>
      %102 = math.tanh %101 : vector<4x32xf32>
      %103 = tpu.concatenate %102, %72 in 1 : vector<4x32xf32>, vector<4x32xf32> -> vector<4x64xf32>
      %104 = arith.truncf %103 : vector<4x64xf32> to vector<4x64xbf16>
      %cst_34 = arith.constant dense<0.000000e+00> : vector<4x128xf32>
      %105 = tpu.matmul %104, %12, %cst_34 {dimension_numbers = #tpu.dot_dimension_numbers<[1], [0], [0], [1], [0, 0, 1, 1], [], []>} : vector<4x64xbf16>, vector<64x128xbf16>, vector<4x128xf32> -> vector<4x128xf32>
      %106 = vector.broadcast %13 : vector<1x128xf32> to vector<4x128xf32>
      %107 = arith.addf %105, %106 : vector<4x128xf32>
      %108 = math.tanh %107 : vector<4x128xf32>
      %109 = arith.negf %107 : vector<4x128xf32>
      %110 = math.exp %109 : vector<4x128xf32>
      %cst_35 = arith.constant 1.000000e+00 : f32
      %111 = vector.broadcast %cst_35 : f32 to vector<4x128xf32>
      %112 = arith.addf %111, %110 : vector<4x128xf32>
      %113 = arith.divf %111, %112 : vector<4x128xf32>
      %114 = arith.select %20, %108, %113 : vector<4x128xi1>, vector<4x128xf32>
      %115 = vector.extract_strided_slice %114 {offsets = [0, 0], sizes = [4, 32], strides = [1, 1]} : vector<4x128xf32> to vector<4x32xf32>
      %116 = vector.extract_strided_slice %114 {offsets = [0, 32], sizes = [4, 32], strides = [1, 1]} : vector<4x128xf32> to vector<4x32xf32>
      %117 = vector.extract_strided_slice %114 {offsets = [0, 64], sizes = [4, 32], strides = [1, 1]} : vector<4x128xf32> to vector<4x32xf32>
      %118 = vector.extract_strided_slice %114 {offsets = [0, 96], sizes = [4, 32], strides = [1, 1]} : vector<4x128xf32> to vector<4x32xf32>
      %119 = arith.mulf %116, %69 : vector<4x32xf32>
      %120 = arith.mulf %115, %117 : vector<4x32xf32>
      %121 = arith.addf %119, %120 : vector<4x32xf32>
      %122 = math.tanh %121 : vector<4x32xf32>
      %123 = arith.mulf %118, %122 : vector<4x32xf32>
      %124 = math.tanh %123 : vector<4x32xf32>
      %125 = vector.broadcast %79 : i32 to vector<4x1xi32>
      %126 = arith.cmpi eq, %14, %125 : vector<4x1xi32>
      %127 = vector.shape_cast %126 : vector<4x1xi1> to vector<4x1xi1>
      %128 = vector.broadcast %127 : vector<4x1xi1> to vector<4x32xi1>
      %129 = arith.select %128, %124, %77 : vector<4x32xi1>, vector<4x32xf32>
      %c2_i32 = arith.constant 2 : i32
      %c8_i32_36 = arith.constant 8 : i32
      %130 = arith.muli %arg0, %c8_i32_36 : i32
      %131 = arith.addi %130, %c2_i32 : i32
      %132 = arith.index_cast %c2_i32 : i32 to index
      %c0_37 = arith.constant 0 : index
      %c0_38 = arith.constant 0 : index
      %133 = vector.load %arg3[%132, %c0_37, %c0_38] : memref<8x4x128xf32, #tpu.memory_space<vmem>>, vector<1x4x128xf32>
      %134 = vector.shape_cast %133 : vector<1x4x128xf32> to vector<4x128xf32>
      %135 = arith.truncf %102 : vector<4x32xf32> to vector<4x32xbf16>
      %cst_39 = arith.constant dense<0.000000e+00> : vector<4x128xf32>
      %136 = tpu.matmul %135, %11, %cst_39 {dimension_numbers = #tpu.dot_dimension_numbers<[1], [0], [0], [1], [0, 0, 1, 1], [], []>} : vector<4x32xbf16>, vector<32x128xbf16>, vector<4x128xf32> -> vector<4x128xf32>
      %137 = arith.addf %134, %136 : vector<4x128xf32>
      %138 = math.tanh %137 : vector<4x128xf32>
      %139 = arith.negf %137 : vector<4x128xf32>
      %140 = math.exp %139 : vector<4x128xf32>
      %cst_40 = arith.constant 1.000000e+00 : f32
      %141 = vector.broadcast %cst_40 : f32 to vector<4x128xf32>
      %142 = arith.addf %141, %140 : vector<4x128xf32>
      %143 = arith.divf %141, %142 : vector<4x128xf32>
      %144 = arith.select %20, %138, %143 : vector<4x128xi1>, vector<4x128xf32>
      %145 = vector.extract_strided_slice %144 {offsets = [0, 0], sizes = [4, 32], strides = [1, 1]} : vector<4x128xf32> to vector<4x32xf32>
      %146 = vector.extract_strided_slice %144 {offsets = [0, 32], sizes = [4, 32], strides = [1, 1]} : vector<4x128xf32> to vector<4x32xf32>
      %147 = vector.extract_strided_slice %144 {offsets = [0, 64], sizes = [4, 32], strides = [1, 1]} : vector<4x128xf32> to vector<4x32xf32>
      %148 = vector.extract_strided_slice %144 {offsets = [0, 96], sizes = [4, 32], strides = [1, 1]} : vector<4x128xf32> to vector<4x32xf32>
      %149 = arith.mulf %146, %99 : vector<4x32xf32>
      %150 = arith.mulf %145, %147 : vector<4x32xf32>
      %151 = arith.addf %149, %150 : vector<4x32xf32>
      %152 = math.tanh %151 : vector<4x32xf32>
      %153 = arith.mulf %148, %152 : vector<4x32xf32>
      %154 = math.tanh %153 : vector<4x32xf32>
      %155 = tpu.concatenate %154, %124 in 1 : vector<4x32xf32>, vector<4x32xf32> -> vector<4x64xf32>
      %156 = arith.truncf %155 : vector<4x64xf32> to vector<4x64xbf16>
      %cst_41 = arith.constant dense<0.000000e+00> : vector<4x128xf32>
      %157 = tpu.matmul %156, %12, %cst_41 {dimension_numbers = #tpu.dot_dimension_numbers<[1], [0], [0], [1], [0, 0, 1, 1], [], []>} : vector<4x64xbf16>, vector<64x128xbf16>, vector<4x128xf32> -> vector<4x128xf32>
      %158 = vector.broadcast %13 : vector<1x128xf32> to vector<4x128xf32>
      %159 = arith.addf %157, %158 : vector<4x128xf32>
      %160 = math.tanh %159 : vector<4x128xf32>
      %161 = arith.negf %159 : vector<4x128xf32>
      %162 = math.exp %161 : vector<4x128xf32>
      %cst_42 = arith.constant 1.000000e+00 : f32
      %163 = vector.broadcast %cst_42 : f32 to vector<4x128xf32>
      %164 = arith.addf %163, %162 : vector<4x128xf32>
      %165 = arith.divf %163, %164 : vector<4x128xf32>
      %166 = arith.select %20, %160, %165 : vector<4x128xi1>, vector<4x128xf32>
      %167 = vector.extract_strided_slice %166 {offsets = [0, 0], sizes = [4, 32], strides = [1, 1]} : vector<4x128xf32> to vector<4x32xf32>
      %168 = vector.extract_strided_slice %166 {offsets = [0, 32], sizes = [4, 32], strides = [1, 1]} : vector<4x128xf32> to vector<4x32xf32>
      %169 = vector.extract_strided_slice %166 {offsets = [0, 64], sizes = [4, 32], strides = [1, 1]} : vector<4x128xf32> to vector<4x32xf32>
      %170 = vector.extract_strided_slice %166 {offsets = [0, 96], sizes = [4, 32], strides = [1, 1]} : vector<4x128xf32> to vector<4x32xf32>
      %171 = arith.mulf %168, %121 : vector<4x32xf32>
      %172 = arith.mulf %167, %169 : vector<4x32xf32>
      %173 = arith.addf %171, %172 : vector<4x32xf32>
      %174 = math.tanh %173 : vector<4x32xf32>
      %175 = arith.mulf %170, %174 : vector<4x32xf32>
      %176 = math.tanh %175 : vector<4x32xf32>
      %177 = vector.broadcast %131 : i32 to vector<4x1xi32>
      %178 = arith.cmpi eq, %14, %177 : vector<4x1xi32>
      %179 = vector.shape_cast %178 : vector<4x1xi1> to vector<4x1xi1>
      %180 = vector.broadcast %179 : vector<4x1xi1> to vector<4x32xi1>
      %181 = arith.select %180, %176, %129 : vector<4x32xi1>, vector<4x32xf32>
      %c3_i32 = arith.constant 3 : i32
      %c8_i32_43 = arith.constant 8 : i32
      %182 = arith.muli %arg0, %c8_i32_43 : i32
      %183 = arith.addi %182, %c3_i32 : i32
      %184 = arith.index_cast %c3_i32 : i32 to index
      %c0_44 = arith.constant 0 : index
      %c0_45 = arith.constant 0 : index
      %185 = vector.load %arg3[%184, %c0_44, %c0_45] : memref<8x4x128xf32, #tpu.memory_space<vmem>>, vector<1x4x128xf32>
      %186 = vector.shape_cast %185 : vector<1x4x128xf32> to vector<4x128xf32>
      %187 = arith.truncf %154 : vector<4x32xf32> to vector<4x32xbf16>
      %cst_46 = arith.constant dense<0.000000e+00> : vector<4x128xf32>
      %188 = tpu.matmul %187, %11, %cst_46 {dimension_numbers = #tpu.dot_dimension_numbers<[1], [0], [0], [1], [0, 0, 1, 1], [], []>} : vector<4x32xbf16>, vector<32x128xbf16>, vector<4x128xf32> -> vector<4x128xf32>
      %189 = arith.addf %186, %188 : vector<4x128xf32>
      %190 = math.tanh %189 : vector<4x128xf32>
      %191 = arith.negf %189 : vector<4x128xf32>
      %192 = math.exp %191 : vector<4x128xf32>
      %cst_47 = arith.constant 1.000000e+00 : f32
      %193 = vector.broadcast %cst_47 : f32 to vector<4x128xf32>
      %194 = arith.addf %193, %192 : vector<4x128xf32>
      %195 = arith.divf %193, %194 : vector<4x128xf32>
      %196 = arith.select %20, %190, %195 : vector<4x128xi1>, vector<4x128xf32>
      %197 = vector.extract_strided_slice %196 {offsets = [0, 0], sizes = [4, 32], strides = [1, 1]} : vector<4x128xf32> to vector<4x32xf32>
      %198 = vector.extract_strided_slice %196 {offsets = [0, 32], sizes = [4, 32], strides = [1, 1]} : vector<4x128xf32> to vector<4x32xf32>
      %199 = vector.extract_strided_slice %196 {offsets = [0, 64], sizes = [4, 32], strides = [1, 1]} : vector<4x128xf32> to vector<4x32xf32>
      %200 = vector.extract_strided_slice %196 {offsets = [0, 96], sizes = [4, 32], strides = [1, 1]} : vector<4x128xf32> to vector<4x32xf32>
      %201 = arith.mulf %198, %151 : vector<4x32xf32>
      %202 = arith.mulf %197, %199 : vector<4x32xf32>
      %203 = arith.addf %201, %202 : vector<4x32xf32>
      %204 = math.tanh %203 : vector<4x32xf32>
      %205 = arith.mulf %200, %204 : vector<4x32xf32>
      %206 = math.tanh %205 : vector<4x32xf32>
      %207 = tpu.concatenate %206, %176 in 1 : vector<4x32xf32>, vector<4x32xf32> -> vector<4x64xf32>
      %208 = arith.truncf %207 : vector<4x64xf32> to vector<4x64xbf16>
      %cst_48 = arith.constant dense<0.000000e+00> : vector<4x128xf32>
      %209 = tpu.matmul %208, %12, %cst_48 {dimension_numbers = #tpu.dot_dimension_numbers<[1], [0], [0], [1], [0, 0, 1, 1], [], []>} : vector<4x64xbf16>, vector<64x128xbf16>, vector<4x128xf32> -> vector<4x128xf32>
      %210 = vector.broadcast %13 : vector<1x128xf32> to vector<4x128xf32>
      %211 = arith.addf %209, %210 : vector<4x128xf32>
      %212 = math.tanh %211 : vector<4x128xf32>
      %213 = arith.negf %211 : vector<4x128xf32>
      %214 = math.exp %213 : vector<4x128xf32>
      %cst_49 = arith.constant 1.000000e+00 : f32
      %215 = vector.broadcast %cst_49 : f32 to vector<4x128xf32>
      %216 = arith.addf %215, %214 : vector<4x128xf32>
      %217 = arith.divf %215, %216 : vector<4x128xf32>
      %218 = arith.select %20, %212, %217 : vector<4x128xi1>, vector<4x128xf32>
      %219 = vector.extract_strided_slice %218 {offsets = [0, 0], sizes = [4, 32], strides = [1, 1]} : vector<4x128xf32> to vector<4x32xf32>
      %220 = vector.extract_strided_slice %218 {offsets = [0, 32], sizes = [4, 32], strides = [1, 1]} : vector<4x128xf32> to vector<4x32xf32>
      %221 = vector.extract_strided_slice %218 {offsets = [0, 64], sizes = [4, 32], strides = [1, 1]} : vector<4x128xf32> to vector<4x32xf32>
      %222 = vector.extract_strided_slice %218 {offsets = [0, 96], sizes = [4, 32], strides = [1, 1]} : vector<4x128xf32> to vector<4x32xf32>
      %223 = arith.mulf %220, %173 : vector<4x32xf32>
      %224 = arith.mulf %219, %221 : vector<4x32xf32>
      %225 = arith.addf %223, %224 : vector<4x32xf32>
      %226 = math.tanh %225 : vector<4x32xf32>
      %227 = arith.mulf %222, %226 : vector<4x32xf32>
      %228 = math.tanh %227 : vector<4x32xf32>
      %229 = vector.broadcast %183 : i32 to vector<4x1xi32>
      %230 = arith.cmpi eq, %14, %229 : vector<4x1xi32>
      %231 = vector.shape_cast %230 : vector<4x1xi1> to vector<4x1xi1>
      %232 = vector.broadcast %231 : vector<4x1xi1> to vector<4x32xi1>
      %233 = arith.select %232, %228, %181 : vector<4x32xi1>, vector<4x32xf32>
      %c4_i32 = arith.constant 4 : i32
      %c8_i32_50 = arith.constant 8 : i32
      %234 = arith.muli %arg0, %c8_i32_50 : i32
      %235 = arith.addi %234, %c4_i32 : i32
      %236 = arith.index_cast %c4_i32 : i32 to index
      %c0_51 = arith.constant 0 : index
      %c0_52 = arith.constant 0 : index
      %237 = vector.load %arg3[%236, %c0_51, %c0_52] : memref<8x4x128xf32, #tpu.memory_space<vmem>>, vector<1x4x128xf32>
      %238 = vector.shape_cast %237 : vector<1x4x128xf32> to vector<4x128xf32>
      %239 = arith.truncf %206 : vector<4x32xf32> to vector<4x32xbf16>
      %cst_53 = arith.constant dense<0.000000e+00> : vector<4x128xf32>
      %240 = tpu.matmul %239, %11, %cst_53 {dimension_numbers = #tpu.dot_dimension_numbers<[1], [0], [0], [1], [0, 0, 1, 1], [], []>} : vector<4x32xbf16>, vector<32x128xbf16>, vector<4x128xf32> -> vector<4x128xf32>
      %241 = arith.addf %238, %240 : vector<4x128xf32>
      %242 = math.tanh %241 : vector<4x128xf32>
      %243 = arith.negf %241 : vector<4x128xf32>
      %244 = math.exp %243 : vector<4x128xf32>
      %cst_54 = arith.constant 1.000000e+00 : f32
      %245 = vector.broadcast %cst_54 : f32 to vector<4x128xf32>
      %246 = arith.addf %245, %244 : vector<4x128xf32>
      %247 = arith.divf %245, %246 : vector<4x128xf32>
      %248 = arith.select %20, %242, %247 : vector<4x128xi1>, vector<4x128xf32>
      %249 = vector.extract_strided_slice %248 {offsets = [0, 0], sizes = [4, 32], strides = [1, 1]} : vector<4x128xf32> to vector<4x32xf32>
      %250 = vector.extract_strided_slice %248 {offsets = [0, 32], sizes = [4, 32], strides = [1, 1]} : vector<4x128xf32> to vector<4x32xf32>
      %251 = vector.extract_strided_slice %248 {offsets = [0, 64], sizes = [4, 32], strides = [1, 1]} : vector<4x128xf32> to vector<4x32xf32>
      %252 = vector.extract_strided_slice %248 {offsets = [0, 96], sizes = [4, 32], strides = [1, 1]} : vector<4x128xf32> to vector<4x32xf32>
      %253 = arith.mulf %250, %203 : vector<4x32xf32>
      %254 = arith.mulf %249, %251 : vector<4x32xf32>
      %255 = arith.addf %253, %254 : vector<4x32xf32>
      %256 = math.tanh %255 : vector<4x32xf32>
      %257 = arith.mulf %252, %256 : vector<4x32xf32>
      %258 = math.tanh %257 : vector<4x32xf32>
      %259 = tpu.concatenate %258, %228 in 1 : vector<4x32xf32>, vector<4x32xf32> -> vector<4x64xf32>
      %260 = arith.truncf %259 : vector<4x64xf32> to vector<4x64xbf16>
      %cst_55 = arith.constant dense<0.000000e+00> : vector<4x128xf32>
      %261 = tpu.matmul %260, %12, %cst_55 {dimension_numbers = #tpu.dot_dimension_numbers<[1], [0], [0], [1], [0, 0, 1, 1], [], []>} : vector<4x64xbf16>, vector<64x128xbf16>, vector<4x128xf32> -> vector<4x128xf32>
      %262 = vector.broadcast %13 : vector<1x128xf32> to vector<4x128xf32>
      %263 = arith.addf %261, %262 : vector<4x128xf32>
      %264 = math.tanh %263 : vector<4x128xf32>
      %265 = arith.negf %263 : vector<4x128xf32>
      %266 = math.exp %265 : vector<4x128xf32>
      %cst_56 = arith.constant 1.000000e+00 : f32
      %267 = vector.broadcast %cst_56 : f32 to vector<4x128xf32>
      %268 = arith.addf %267, %266 : vector<4x128xf32>
      %269 = arith.divf %267, %268 : vector<4x128xf32>
      %270 = arith.select %20, %264, %269 : vector<4x128xi1>, vector<4x128xf32>
      %271 = vector.extract_strided_slice %270 {offsets = [0, 0], sizes = [4, 32], strides = [1, 1]} : vector<4x128xf32> to vector<4x32xf32>
      %272 = vector.extract_strided_slice %270 {offsets = [0, 32], sizes = [4, 32], strides = [1, 1]} : vector<4x128xf32> to vector<4x32xf32>
      %273 = vector.extract_strided_slice %270 {offsets = [0, 64], sizes = [4, 32], strides = [1, 1]} : vector<4x128xf32> to vector<4x32xf32>
      %274 = vector.extract_strided_slice %270 {offsets = [0, 96], sizes = [4, 32], strides = [1, 1]} : vector<4x128xf32> to vector<4x32xf32>
      %275 = arith.mulf %272, %225 : vector<4x32xf32>
      %276 = arith.mulf %271, %273 : vector<4x32xf32>
      %277 = arith.addf %275, %276 : vector<4x32xf32>
      %278 = math.tanh %277 : vector<4x32xf32>
      %279 = arith.mulf %274, %278 : vector<4x32xf32>
      %280 = math.tanh %279 : vector<4x32xf32>
      %281 = vector.broadcast %235 : i32 to vector<4x1xi32>
      %282 = arith.cmpi eq, %14, %281 : vector<4x1xi32>
      %283 = vector.shape_cast %282 : vector<4x1xi1> to vector<4x1xi1>
      %284 = vector.broadcast %283 : vector<4x1xi1> to vector<4x32xi1>
      %285 = arith.select %284, %280, %233 : vector<4x32xi1>, vector<4x32xf32>
      %c5_i32 = arith.constant 5 : i32
      %c8_i32_57 = arith.constant 8 : i32
      %286 = arith.muli %arg0, %c8_i32_57 : i32
      %287 = arith.addi %286, %c5_i32 : i32
      %288 = arith.index_cast %c5_i32 : i32 to index
      %c0_58 = arith.constant 0 : index
      %c0_59 = arith.constant 0 : index
      %289 = vector.load %arg3[%288, %c0_58, %c0_59] : memref<8x4x128xf32, #tpu.memory_space<vmem>>, vector<1x4x128xf32>
      %290 = vector.shape_cast %289 : vector<1x4x128xf32> to vector<4x128xf32>
      %291 = arith.truncf %258 : vector<4x32xf32> to vector<4x32xbf16>
      %cst_60 = arith.constant dense<0.000000e+00> : vector<4x128xf32>
      %292 = tpu.matmul %291, %11, %cst_60 {dimension_numbers = #tpu.dot_dimension_numbers<[1], [0], [0], [1], [0, 0, 1, 1], [], []>} : vector<4x32xbf16>, vector<32x128xbf16>, vector<4x128xf32> -> vector<4x128xf32>
      %293 = arith.addf %290, %292 : vector<4x128xf32>
      %294 = math.tanh %293 : vector<4x128xf32>
      %295 = arith.negf %293 : vector<4x128xf32>
      %296 = math.exp %295 : vector<4x128xf32>
      %cst_61 = arith.constant 1.000000e+00 : f32
      %297 = vector.broadcast %cst_61 : f32 to vector<4x128xf32>
      %298 = arith.addf %297, %296 : vector<4x128xf32>
      %299 = arith.divf %297, %298 : vector<4x128xf32>
      %300 = arith.select %20, %294, %299 : vector<4x128xi1>, vector<4x128xf32>
      %301 = vector.extract_strided_slice %300 {offsets = [0, 0], sizes = [4, 32], strides = [1, 1]} : vector<4x128xf32> to vector<4x32xf32>
      %302 = vector.extract_strided_slice %300 {offsets = [0, 32], sizes = [4, 32], strides = [1, 1]} : vector<4x128xf32> to vector<4x32xf32>
      %303 = vector.extract_strided_slice %300 {offsets = [0, 64], sizes = [4, 32], strides = [1, 1]} : vector<4x128xf32> to vector<4x32xf32>
      %304 = vector.extract_strided_slice %300 {offsets = [0, 96], sizes = [4, 32], strides = [1, 1]} : vector<4x128xf32> to vector<4x32xf32>
      %305 = arith.mulf %302, %255 : vector<4x32xf32>
      %306 = arith.mulf %301, %303 : vector<4x32xf32>
      %307 = arith.addf %305, %306 : vector<4x32xf32>
      %308 = math.tanh %307 : vector<4x32xf32>
      %309 = arith.mulf %304, %308 : vector<4x32xf32>
      %310 = math.tanh %309 : vector<4x32xf32>
      %311 = tpu.concatenate %310, %280 in 1 : vector<4x32xf32>, vector<4x32xf32> -> vector<4x64xf32>
      %312 = arith.truncf %311 : vector<4x64xf32> to vector<4x64xbf16>
      %cst_62 = arith.constant dense<0.000000e+00> : vector<4x128xf32>
      %313 = tpu.matmul %312, %12, %cst_62 {dimension_numbers = #tpu.dot_dimension_numbers<[1], [0], [0], [1], [0, 0, 1, 1], [], []>} : vector<4x64xbf16>, vector<64x128xbf16>, vector<4x128xf32> -> vector<4x128xf32>
      %314 = vector.broadcast %13 : vector<1x128xf32> to vector<4x128xf32>
      %315 = arith.addf %313, %314 : vector<4x128xf32>
      %316 = math.tanh %315 : vector<4x128xf32>
      %317 = arith.negf %315 : vector<4x128xf32>
      %318 = math.exp %317 : vector<4x128xf32>
      %cst_63 = arith.constant 1.000000e+00 : f32
      %319 = vector.broadcast %cst_63 : f32 to vector<4x128xf32>
      %320 = arith.addf %319, %318 : vector<4x128xf32>
      %321 = arith.divf %319, %320 : vector<4x128xf32>
      %322 = arith.select %20, %316, %321 : vector<4x128xi1>, vector<4x128xf32>
      %323 = vector.extract_strided_slice %322 {offsets = [0, 0], sizes = [4, 32], strides = [1, 1]} : vector<4x128xf32> to vector<4x32xf32>
      %324 = vector.extract_strided_slice %322 {offsets = [0, 32], sizes = [4, 32], strides = [1, 1]} : vector<4x128xf32> to vector<4x32xf32>
      %325 = vector.extract_strided_slice %322 {offsets = [0, 64], sizes = [4, 32], strides = [1, 1]} : vector<4x128xf32> to vector<4x32xf32>
      %326 = vector.extract_strided_slice %322 {offsets = [0, 96], sizes = [4, 32], strides = [1, 1]} : vector<4x128xf32> to vector<4x32xf32>
      %327 = arith.mulf %324, %277 : vector<4x32xf32>
      %328 = arith.mulf %323, %325 : vector<4x32xf32>
      %329 = arith.addf %327, %328 : vector<4x32xf32>
      %330 = math.tanh %329 : vector<4x32xf32>
      %331 = arith.mulf %326, %330 : vector<4x32xf32>
      %332 = math.tanh %331 : vector<4x32xf32>
      %333 = vector.broadcast %287 : i32 to vector<4x1xi32>
      %334 = arith.cmpi eq, %14, %333 : vector<4x1xi32>
      %335 = vector.shape_cast %334 : vector<4x1xi1> to vector<4x1xi1>
      %336 = vector.broadcast %335 : vector<4x1xi1> to vector<4x32xi1>
      %337 = arith.select %336, %332, %285 : vector<4x32xi1>, vector<4x32xf32>
      %c6_i32 = arith.constant 6 : i32
      %c8_i32_64 = arith.constant 8 : i32
      %338 = arith.muli %arg0, %c8_i32_64 : i32
      %339 = arith.addi %338, %c6_i32 : i32
      %340 = arith.index_cast %c6_i32 : i32 to index
      %c0_65 = arith.constant 0 : index
      %c0_66 = arith.constant 0 : index
      %341 = vector.load %arg3[%340, %c0_65, %c0_66] : memref<8x4x128xf32, #tpu.memory_space<vmem>>, vector<1x4x128xf32>
      %342 = vector.shape_cast %341 : vector<1x4x128xf32> to vector<4x128xf32>
      %343 = arith.truncf %310 : vector<4x32xf32> to vector<4x32xbf16>
      %cst_67 = arith.constant dense<0.000000e+00> : vector<4x128xf32>
      %344 = tpu.matmul %343, %11, %cst_67 {dimension_numbers = #tpu.dot_dimension_numbers<[1], [0], [0], [1], [0, 0, 1, 1], [], []>} : vector<4x32xbf16>, vector<32x128xbf16>, vector<4x128xf32> -> vector<4x128xf32>
      %345 = arith.addf %342, %344 : vector<4x128xf32>
      %346 = math.tanh %345 : vector<4x128xf32>
      %347 = arith.negf %345 : vector<4x128xf32>
      %348 = math.exp %347 : vector<4x128xf32>
      %cst_68 = arith.constant 1.000000e+00 : f32
      %349 = vector.broadcast %cst_68 : f32 to vector<4x128xf32>
      %350 = arith.addf %349, %348 : vector<4x128xf32>
      %351 = arith.divf %349, %350 : vector<4x128xf32>
      %352 = arith.select %20, %346, %351 : vector<4x128xi1>, vector<4x128xf32>
      %353 = vector.extract_strided_slice %352 {offsets = [0, 0], sizes = [4, 32], strides = [1, 1]} : vector<4x128xf32> to vector<4x32xf32>
      %354 = vector.extract_strided_slice %352 {offsets = [0, 32], sizes = [4, 32], strides = [1, 1]} : vector<4x128xf32> to vector<4x32xf32>
      %355 = vector.extract_strided_slice %352 {offsets = [0, 64], sizes = [4, 32], strides = [1, 1]} : vector<4x128xf32> to vector<4x32xf32>
      %356 = vector.extract_strided_slice %352 {offsets = [0, 96], sizes = [4, 32], strides = [1, 1]} : vector<4x128xf32> to vector<4x32xf32>
      %357 = arith.mulf %354, %307 : vector<4x32xf32>
      %358 = arith.mulf %353, %355 : vector<4x32xf32>
      %359 = arith.addf %357, %358 : vector<4x32xf32>
      %360 = math.tanh %359 : vector<4x32xf32>
      %361 = arith.mulf %356, %360 : vector<4x32xf32>
      %362 = math.tanh %361 : vector<4x32xf32>
      %363 = tpu.concatenate %362, %332 in 1 : vector<4x32xf32>, vector<4x32xf32> -> vector<4x64xf32>
      %364 = arith.truncf %363 : vector<4x64xf32> to vector<4x64xbf16>
      %cst_69 = arith.constant dense<0.000000e+00> : vector<4x128xf32>
      %365 = tpu.matmul %364, %12, %cst_69 {dimension_numbers = #tpu.dot_dimension_numbers<[1], [0], [0], [1], [0, 0, 1, 1], [], []>} : vector<4x64xbf16>, vector<64x128xbf16>, vector<4x128xf32> -> vector<4x128xf32>
      %366 = vector.broadcast %13 : vector<1x128xf32> to vector<4x128xf32>
      %367 = arith.addf %365, %366 : vector<4x128xf32>
      %368 = math.tanh %367 : vector<4x128xf32>
      %369 = arith.negf %367 : vector<4x128xf32>
      %370 = math.exp %369 : vector<4x128xf32>
      %cst_70 = arith.constant 1.000000e+00 : f32
      %371 = vector.broadcast %cst_70 : f32 to vector<4x128xf32>
      %372 = arith.addf %371, %370 : vector<4x128xf32>
      %373 = arith.divf %371, %372 : vector<4x128xf32>
      %374 = arith.select %20, %368, %373 : vector<4x128xi1>, vector<4x128xf32>
      %375 = vector.extract_strided_slice %374 {offsets = [0, 0], sizes = [4, 32], strides = [1, 1]} : vector<4x128xf32> to vector<4x32xf32>
      %376 = vector.extract_strided_slice %374 {offsets = [0, 32], sizes = [4, 32], strides = [1, 1]} : vector<4x128xf32> to vector<4x32xf32>
      %377 = vector.extract_strided_slice %374 {offsets = [0, 64], sizes = [4, 32], strides = [1, 1]} : vector<4x128xf32> to vector<4x32xf32>
      %378 = vector.extract_strided_slice %374 {offsets = [0, 96], sizes = [4, 32], strides = [1, 1]} : vector<4x128xf32> to vector<4x32xf32>
      %379 = arith.mulf %376, %329 : vector<4x32xf32>
      %380 = arith.mulf %375, %377 : vector<4x32xf32>
      %381 = arith.addf %379, %380 : vector<4x32xf32>
      %382 = math.tanh %381 : vector<4x32xf32>
      %383 = arith.mulf %378, %382 : vector<4x32xf32>
      %384 = math.tanh %383 : vector<4x32xf32>
      %385 = vector.broadcast %339 : i32 to vector<4x1xi32>
      %386 = arith.cmpi eq, %14, %385 : vector<4x1xi32>
      %387 = vector.shape_cast %386 : vector<4x1xi1> to vector<4x1xi1>
      %388 = vector.broadcast %387 : vector<4x1xi1> to vector<4x32xi1>
      %389 = arith.select %388, %384, %337 : vector<4x32xi1>, vector<4x32xf32>
      %c7_i32 = arith.constant 7 : i32
      %c8_i32_71 = arith.constant 8 : i32
      %390 = arith.muli %arg0, %c8_i32_71 : i32
      %391 = arith.addi %390, %c7_i32 : i32
      %392 = arith.index_cast %c7_i32 : i32 to index
      %c0_72 = arith.constant 0 : index
      %c0_73 = arith.constant 0 : index
      %393 = vector.load %arg3[%392, %c0_72, %c0_73] : memref<8x4x128xf32, #tpu.memory_space<vmem>>, vector<1x4x128xf32>
      %394 = vector.shape_cast %393 : vector<1x4x128xf32> to vector<4x128xf32>
      %395 = arith.truncf %362 : vector<4x32xf32> to vector<4x32xbf16>
      %cst_74 = arith.constant dense<0.000000e+00> : vector<4x128xf32>
      %396 = tpu.matmul %395, %11, %cst_74 {dimension_numbers = #tpu.dot_dimension_numbers<[1], [0], [0], [1], [0, 0, 1, 1], [], []>} : vector<4x32xbf16>, vector<32x128xbf16>, vector<4x128xf32> -> vector<4x128xf32>
      %397 = arith.addf %394, %396 : vector<4x128xf32>
      %398 = math.tanh %397 : vector<4x128xf32>
      %399 = arith.negf %397 : vector<4x128xf32>
      %400 = math.exp %399 : vector<4x128xf32>
      %cst_75 = arith.constant 1.000000e+00 : f32
      %401 = vector.broadcast %cst_75 : f32 to vector<4x128xf32>
      %402 = arith.addf %401, %400 : vector<4x128xf32>
      %403 = arith.divf %401, %402 : vector<4x128xf32>
      %404 = arith.select %20, %398, %403 : vector<4x128xi1>, vector<4x128xf32>
      %405 = vector.extract_strided_slice %404 {offsets = [0, 0], sizes = [4, 32], strides = [1, 1]} : vector<4x128xf32> to vector<4x32xf32>
      %406 = vector.extract_strided_slice %404 {offsets = [0, 32], sizes = [4, 32], strides = [1, 1]} : vector<4x128xf32> to vector<4x32xf32>
      %407 = vector.extract_strided_slice %404 {offsets = [0, 64], sizes = [4, 32], strides = [1, 1]} : vector<4x128xf32> to vector<4x32xf32>
      %408 = vector.extract_strided_slice %404 {offsets = [0, 96], sizes = [4, 32], strides = [1, 1]} : vector<4x128xf32> to vector<4x32xf32>
      %409 = arith.mulf %406, %359 : vector<4x32xf32>
      %410 = arith.mulf %405, %407 : vector<4x32xf32>
      %411 = arith.addf %409, %410 : vector<4x32xf32>
      %412 = math.tanh %411 : vector<4x32xf32>
      %413 = arith.mulf %408, %412 : vector<4x32xf32>
      %414 = math.tanh %413 : vector<4x32xf32>
      %415 = tpu.concatenate %414, %384 in 1 : vector<4x32xf32>, vector<4x32xf32> -> vector<4x64xf32>
      %416 = arith.truncf %415 : vector<4x64xf32> to vector<4x64xbf16>
      %cst_76 = arith.constant dense<0.000000e+00> : vector<4x128xf32>
      %417 = tpu.matmul %416, %12, %cst_76 {dimension_numbers = #tpu.dot_dimension_numbers<[1], [0], [0], [1], [0, 0, 1, 1], [], []>} : vector<4x64xbf16>, vector<64x128xbf16>, vector<4x128xf32> -> vector<4x128xf32>
      %418 = vector.broadcast %13 : vector<1x128xf32> to vector<4x128xf32>
      %419 = arith.addf %417, %418 : vector<4x128xf32>
      %420 = math.tanh %419 : vector<4x128xf32>
      %421 = arith.negf %419 : vector<4x128xf32>
      %422 = math.exp %421 : vector<4x128xf32>
      %cst_77 = arith.constant 1.000000e+00 : f32
      %423 = vector.broadcast %cst_77 : f32 to vector<4x128xf32>
      %424 = arith.addf %423, %422 : vector<4x128xf32>
      %425 = arith.divf %423, %424 : vector<4x128xf32>
      %426 = arith.select %20, %420, %425 : vector<4x128xi1>, vector<4x128xf32>
      %427 = vector.extract_strided_slice %426 {offsets = [0, 0], sizes = [4, 32], strides = [1, 1]} : vector<4x128xf32> to vector<4x32xf32>
      %428 = vector.extract_strided_slice %426 {offsets = [0, 32], sizes = [4, 32], strides = [1, 1]} : vector<4x128xf32> to vector<4x32xf32>
      %429 = vector.extract_strided_slice %426 {offsets = [0, 64], sizes = [4, 32], strides = [1, 1]} : vector<4x128xf32> to vector<4x32xf32>
      %430 = vector.extract_strided_slice %426 {offsets = [0, 96], sizes = [4, 32], strides = [1, 1]} : vector<4x128xf32> to vector<4x32xf32>
      %431 = arith.mulf %428, %381 : vector<4x32xf32>
      %432 = arith.mulf %427, %429 : vector<4x32xf32>
      %433 = arith.addf %431, %432 : vector<4x32xf32>
      %434 = math.tanh %433 : vector<4x32xf32>
      %435 = arith.mulf %430, %434 : vector<4x32xf32>
      %436 = math.tanh %435 : vector<4x32xf32>
      %437 = vector.broadcast %391 : i32 to vector<4x1xi32>
      %438 = arith.cmpi eq, %14, %437 : vector<4x1xi32>
      %439 = vector.shape_cast %438 : vector<4x1xi1> to vector<4x1xi1>
      %440 = vector.broadcast %439 : vector<4x1xi1> to vector<4x32xi1>
      %441 = arith.select %440, %436, %389 : vector<4x32xi1>, vector<4x32xf32>
      %c8_i32_78 = arith.constant 8 : i32
      %c0_79 = arith.constant 0 : index
      %c0_80 = arith.constant 0 : index
      %442 = vector.load %arg12[%c0_79, %c0_80] : memref<4x32xf32, #tpu.memory_space<vmem>>, vector<4x32xf32>
      tpu.vector_store %arg12[%c0_79, %c0_80], %414 {strides = array<i32>} : memref<4x32xf32, #tpu.memory_space<vmem>>, vector<4x32xf32>,
      %c0_81 = arith.constant 0 : index
      %c0_82 = arith.constant 0 : index
      %443 = vector.load %arg13[%c0_81, %c0_82] : memref<4x32xf32, #tpu.memory_space<vmem>>, vector<4x32xf32>
      tpu.vector_store %arg13[%c0_81, %c0_82], %411 {strides = array<i32>} : memref<4x32xf32, #tpu.memory_space<vmem>>, vector<4x32xf32>,
      %c0_83 = arith.constant 0 : index
      %c0_84 = arith.constant 0 : index
      %444 = vector.load %arg14[%c0_83, %c0_84] : memref<4x32xf32, #tpu.memory_space<vmem>>, vector<4x32xf32>
      tpu.vector_store %arg14[%c0_83, %c0_84], %436 {strides = array<i32>} : memref<4x32xf32, #tpu.memory_space<vmem>>, vector<4x32xf32>,
      %c0_85 = arith.constant 0 : index
      %c0_86 = arith.constant 0 : index
      %445 = vector.load %arg15[%c0_85, %c0_86] : memref<4x32xf32, #tpu.memory_space<vmem>>, vector<4x32xf32>
      tpu.vector_store %arg15[%c0_85, %c0_86], %433 {strides = array<i32>} : memref<4x32xf32, #tpu.memory_space<vmem>>, vector<4x32xf32>,
      %c0_87 = arith.constant 0 : index
      %c0_88 = arith.constant 0 : index
      %446 = vector.load %arg16[%c0_87, %c0_88] : memref<4x32xf32, #tpu.memory_space<vmem>>, vector<4x32xf32>
      tpu.vector_store %arg16[%c0_87, %c0_88], %441 {strides = array<i32>} : memref<4x32xf32, #tpu.memory_space<vmem>>, vector<4x32xf32>,
    } else {
    }
    %c0_i32_2 = arith.constant 0 : i32
    %8 = arith.cmpi eq, %arg0, %c0_i32_2 : i32
    %9 = arith.extui %8 : i1 to i32
    %c0_i32_3 = arith.constant 0 : i32
    %10 = arith.cmpi ne, %9, %c0_i32_3 : i32
    scf.if %10 {
      %c0_4 = arith.constant 0 : index
      %c0_5 = arith.constant 0 : index
      %11 = vector.load %arg5[%c0_4, %c0_5] : memref<32x8xbf16, #tpu.memory_space<vmem>>, vector<32x8xbf16>
      %c0_6 = arith.constant 0 : index
      %c0_7 = arith.constant 0 : index
      %12 = vector.load %arg16[%c0_6, %c0_7] : memref<4x32xf32, #tpu.memory_space<vmem>>, vector<4x32xf32>
      %13 = arith.truncf %12 : vector<4x32xf32> to vector<4x32xbf16>
      %cst = arith.constant dense<0.000000e+00> : vector<4x8xf32>
      %14 = tpu.matmul %13, %11, %cst {dimension_numbers = #tpu.dot_dimension_numbers<[1], [0], [0], [1], [0, 0, 1, 1], [], []>} : vector<4x32xbf16>, vector<32x8xbf16>, vector<4x8xf32> -> vector<4x8xf32>
      %c0_8 = arith.constant 0 : index
      %c0_9 = arith.constant 0 : index
      %15 = vector.load %arg6[%c0_8, %c0_9] : memref<1x8xf32, #tpu.memory_space<vmem>>, vector<1x8xf32>
      %16 = vector.broadcast %15 : vector<1x8xf32> to vector<4x8xf32>
      %17 = arith.addf %14, %16 : vector<4x8xf32>
      %cst_10 = arith.constant dense<0xFF800000> : vector<4xf32>
      %18 = vector.multi_reduction <maximumf>, %17, %cst_10 [1] : vector<4x8xf32> to vector<4xf32>
      %19 = vector.shape_cast %18 : vector<4xf32> to vector<4x1xf32>
      %20 = vector.broadcast %19 : vector<4x1xf32> to vector<4x8xf32>
      %21 = arith.subf %17, %20 : vector<4x8xf32>
      %22 = math.exp %21 : vector<4x8xf32>
      %cst_11 = arith.constant dense<0.000000e+00> : vector<4xf32>
      %23 = vector.multi_reduction <add>, %22, %cst_11 [1] : vector<4x8xf32> to vector<4xf32>
      %24 = vector.shape_cast %23 : vector<4xf32> to vector<4x1xf32>
      %25 = math.log %24 : vector<4x1xf32>
      %26 = arith.addf %25, %19 : vector<4x1xf32>
      %27 = vector.broadcast %26 : vector<4x1xf32> to vector<4x8xf32>
      %28 = arith.subf %17, %27 : vector<4x8xf32>
      %c0_12 = arith.constant 0 : index
      %c0_13 = arith.constant 0 : index
      %29 = vector.load %arg9[%c0_12, %c0_13] : memref<4x8xf32, #tpu.memory_space<vmem>>, vector<4x8xf32>
      tpu.vector_store %arg9[%c0_12, %c0_13], %28 {strides = array<i32>} : memref<4x8xf32, #tpu.memory_space<vmem>>, vector<4x8xf32>,
    } else {
    }
    return
  }
  func.func @transform_0(%arg0: i32) -> (i32, i32) {
    %c0_i32 = arith.constant 0 : i32
    %c0_i32_0 = arith.constant 0 : i32
    %c0_i32_1 = arith.constant 0 : i32
    return %c0_i32, %c0_i32_0 : i32, i32
  }
  func.func @transform_1(%arg0: i32) -> i32 {
    %c0_i32 = arith.constant 0 : i32
    %c0_i32_0 = arith.constant 0 : i32
    return %c0_i32 : i32
  }
  func.func @transform_2(%arg0: i32) -> (i32, i32, i32) {
    %c0_i32 = arith.constant 0 : i32
    %c0_i32_0 = arith.constant 0 : i32
    %c0_i32_1 = arith.constant 0 : i32
    return %arg0, %c0_i32, %c0_i32_0 : i32, i32, i32
  }
  func.func @transform_3(%arg0: i32) -> (i32, i32) {
    %c0_i32 = arith.constant 0 : i32
    %c0_i32_0 = arith.constant 0 : i32
    %c0_i32_1 = arith.constant 0 : i32
    return %c0_i32, %c0_i32_0 : i32, i32
  }
  func.func @transform_4(%arg0: i32) -> (i32, i32) {
    %c0_i32 = arith.constant 0 : i32
    %c0_i32_0 = arith.constant 0 : i32
    %c0_i32_1 = arith.constant 0 : i32
    return %c0_i32, %c0_i32_0 : i32, i32
  }
  func.func @transform_5(%arg0: i32) -> (i32, i32) {
    %c0_i32 = arith.constant 0 : i32
    %c0_i32_0 = arith.constant 0 : i32
    %c0_i32_1 = arith.constant 0 : i32
    return %c0_i32, %c0_i32_0 : i32, i32
  }
  func.func @transform_8(%arg0: i32) -> (i32, i32) {
    %c0_i32 = arith.constant 0 : i32
    %c0_i32_0 = arith.constant 0 : i32
    %c0_i32_1 = arith.constant 0 : i32
    return %c0_i32, %c0_i32_0 : i32, i32
  }
}

</mosaic_0001>

<bundles_post_ra>
// kernel: lstm_forward.1
= control target key start
LH: loop header
LB: loop body
LE: loop exit
PB: predicated region body
PF: predicated region fallthrough
CT: control target
= control target key end

     0   :  { %14 = vsyncpa [#allocation11], 0  ;;  %s2641_s0 = inlined_call_operand.vmem [shape: s32[4,1], index: 0, kind: input, shape index: {}]   ;;  %s2642_s1 = inlined_call_operand.<no memory space> [shape: s32[1], index: 1, kind: input, shape index: {}]   ;;  %s2643_s2 = inlined_call_operand.vmem [shape: f32[8,4,128], index: 2, kind: input, shape index: {}]   ;;  %s2644_s3 = inlined_call_operand.vmem [shape: f32[1,128], index: 3, kind: input, shape index: {}]   ;;  %s2645_s4 = inlined_call_operand.vmem [shape: bf16[32,8], index: 4, kind: input, shape index: {}]   ;;  %s2646_s5 = inlined_call_operand.vmem [shape: f32[1,8], index: 5, kind: input, shape index: {}]   ;;  %s2647_s6 = inlined_call_operand.vmem [shape: bf16[32,128], index: 6, kind: input, shape index: {}]   ;;  %s2648_s7 = inlined_call_operand.vmem [shape: bf16[64,128], index: 7, kind: input, shape index: {}]   ;;  %s2649_s8 = inlined_call_operand.hbm [shape: f32[4,8], index: 8, kind: output, shape index: {}]  }
   0x1   :  { %v64_v0 = vld [vmem:[%s2647_s6] sm:$0xff]  ;;  %v66_v1 = vld [vmem:[%s2647_s6 + $0x8] sm:$0xff] }
   0x2   :  { %65 = vst [vmem:[#allocation2] sm:$0xff] %v64_v0  ;;  %67 = vst [vmem:[#allocation2 + $0x8] sm:$0xff] %v66_v1 }
   0x3   :  { %75 = vsyncadd [#allocation12], 256 }
   0x4   :  { %2118 = dma.done.wait [#allocation12], 256 }
   0x5   :  { %2119 = vsyncadd [#allocation12], 4294967040 }
   0x6   :  { %v112_v2 = vld [vmem:[%s2648_s7] sm:$0xff]  ;;  %v114_v3 = vld [vmem:[%s2648_s7 + $0x8] sm:$0xff]  ;;  %v116_v4 = vld [vmem:[%s2648_s7 + $0x10] sm:$0xff] }
   0x7   :  { %113 = vst [vmem:[#allocation3] sm:$0xff] %v112_v2  ;;  %115 = vst [vmem:[#allocation3 + $0x8] sm:$0xff] %v114_v3  ;;  %v118_v5 = vld [vmem:[%s2648_s7 + $0x18] sm:$0xff] }
   0x8   :  { %117 = vst [vmem:[#allocation3 + $0x10] sm:$0xff] %v116_v4  ;;  %119 = vst [vmem:[#allocation3 + $0x18] sm:$0xff] %v118_v5 }
   0x9   :  { %127 = vsyncadd [#allocation14], 512 }
   0xa   :  { %2120 = dma.done.wait [#allocation14], 512 }
   0xb   :  { %2121 = vsyncadd [#allocation14], 4294966784  ;;  %vm132_vm0 = vcmask 257024   ;;  %v2124_v6 = vmov 0.0   ;;  %p1629_p0 = scmp.lt.s32.totalorder %s2642_s1, 0 }
   0xc   :  { %133 = vst.msk [vmem:[#allocation4] sm:$0xf] %vm132_vm0, %v2124_v6  ;;  %134 = vst.msk [vmem:[#allocation5] sm:$0xf] %vm132_vm0, %v2124_v6  ;;  %v2209_v7 = vld [vmem:[#allocation2] sm:$0xff] (!%p1629_p0)  ;;  %v2125_v8 = vmov (!%p1629_p0), 0.0   ;;  %v152_v20 = vlaneseq (!%p1629_p0) }
   0xd   :  { %135 = vst.msk [vmem:[#allocation6] sm:$0xf] %vm132_vm0, %v2124_v6  ;;  %136 = vst.msk [vmem:[#allocation7] sm:$0xf] %vm132_vm0, %v2124_v6  ;;  %143 = sbr.rel (%p1629_p0) target bundleno = 6630 (0x19e6), region = 103  ;;  %1741 = vmatprep.subr.bf16.mxu1 (!%p1629_p0), %v2125_v8  ;;  %vm2126_vm1 = vmmov (!%p1629_p0), 0   ;;  %1761 = vmatprep.subr.bf16.mxu0 (!%p1629_p0), %v2125_v8 }
   0xe   :  { %137 = vst.msk [vmem:[#allocation8] sm:$0xf] %vm132_vm0, %v2124_v6  ;;  %1745 = vmatprep.mubr.msk.bf16.mxu1 (!%p1629_p0), %vm2126_vm1, %v2125_v8  ;;  %1742 = vmatpush3.bf16.msra.mxu1 (!%p1629_p0), %v2209_v7  ;;  %v2217_v10 = vld [vmem:[#allocation2 + $0x8] sm:$0xff] (!%p1629_p0)  ;;  %vm164_vm2 = vcmask (!%p1629_p0), 261120   ;;  %v162_v12 = vld [vmem:[%s2643_s2] sm:$0xf] (!%p1629_p0) }
   0xf   :  { %1743 = vmatprep.subr.bf16.mxu1 (!%p1629_p0), %v2125_v8  ;;  %1762 = vmatpush3.bf16.msra.mxu0 (!%p1629_p0), %v2209_v7  ;;  %v153_v22 = vand.u32 (!%p1629_p0), 127, %v152_v20  ;;  %s2127_s18 = smov (!%p1629_p0), 64   ;;  %s2128_s19 = smov (!%p1629_p0), 32   ;;  %v2246_v35 = vld [vmem:[#allocation3] sm:$0xff] (!%p1629_p0)  ;;  %v2250_v36 = vld [vmem:[#allocation3 + $0x8] sm:$0xff] (!%p1629_p0)  ;;  %v2254_v37 = vld [vmem:[#allocation3 + $0x10] sm:$0xff] (!%p1629_p0) }
  0x10   :  { %1763 = vmatprep.subr.bf16.mxu0 (!%p1629_p0), %v2125_v8  ;;  %1765 = vmatprep.mubr.msk.bf16.mxu0 (!%p1629_p0), %vm2126_vm1, %v2125_v8  ;;  %v2258_v40 = vld [vmem:[#allocation3 + $0x18] sm:$0xff] (!%p1629_p0)  ;;  %vm255_vm6 = vcmask (!%p1629_p0), 523264   ;;  %v1635_v51 = vld [vmem:[%s2643_s2 + $0x4] sm:$0xf] (!%p1629_p0)  ;;  %v2289_v58 = vld [vmem:[%s2644_s3] ss:$0 sm:$0xff] (!%p1629_p0) }
  0x11   :  { %vm154_vm3 = vcmp.ge.s32.totalorder (!%p1629_p0), %v153_v22, 64  ;;  %vm155_vm4 = vcmp.lt.s32.totalorder (!%p1629_p0), %v153_v22, 96 }
  0x12   :  { %1744 = vmatpush3.bf16.msra.mxu1 (!%p1629_p0), %v2217_v10  ;;  %vm2233_vm5 = vmand (!%p1629_p0), %vm154_vm3, %vm155_vm4 }
  0x13   :  { %v157_v9 = vld [vmem:[#allocation4] sm:$0xf] (!%p1629_p0)  ;;  %1749 = vmatprep.subr.bf16.mxu1 (!%p1629_p0), %v2125_v8  ;;  %1764 = vmatpush3.bf16.msra.mxu0 (!%p1629_p0), %v2217_v10  ;;  %v158_v27 = vld [vmem:[#allocation5] sm:$0xf] (!%p1629_p0) }
  0x14   :  { %v163_v11 = vpack.c.bf16 %v157_v9, %v157_v9  ;;  %1769 = vmatprep.subr.bf16.mxu0 %v2125_v8  ;;  %v159_v41 = vld [vmem:[#allocation6] sm:$0xf] }
  0x16   :  { %1746 = vmatmul.mubr.msk.bf16.vlgmr.msra.gmra.mrb[0].mxu1 %vm164_vm2, %v163_v11 }
  0x17   :  { %1757 = vmatprep.mubr.msk.bf16.mxu1 %vm2126_vm1, %v2125_v8  ;;  %1750 = vmatpush3.bf16.msra.mxu1 %v2246_v35 }
  0x18   :  { %1751 = vmatprep.subr.bf16.mxu1 %v2125_v8 }
  0x1b   :  { %1752 = vmatpush3.bf16.msra.mxu1 %v2250_v36 }
  0x1c   :  { %1753 = vmatprep.subr.bf16.mxu1 %v2125_v8 }
  0x1f   :  { %1754 = vmatpush3.bf16.msra.mxu1 %v2254_v37 }
  0x20   :  { %1755 = vmatprep.subr.bf16.mxu1 %v2125_v8 }
  0x23   :  { %1756 = vmatpush3.bf16.msra.mxu1 %v2258_v40 }
  0x24   :  { %1781 = vmatprep.subr.bf16.mxu1 %v2125_v8 }
  0xe9   :  { %v202_v13 = vpop.f32.mrb[0].mxu1 }
  0xea   :  { %v208_v14 = vadd.f32 %v202_v13, %v162_v12  ;;  %v1747_v15 = vpop.f32.mrb[1].mxu1 }
  0xeb   :  { %v205_v16 = vpop.f32.mrb[2].mxu1  ;;  %v160_v15 = vld [vmem:[#allocation7] sm:$0xf] }
  0xec   :  { %v1631_v17 = vmul.f32 -1.442695, %v208_v14  ;;  %v1748_v18 = vpop.f32.mrb[3].mxu1 }
  0xee   :  { %1925 = vpow2.f32 %v1631_v17 }
  0xef   :  { %1927 = vtanh.f32 %v208_v14 }
  0xf8   :  { %v1926_v19 = vpop.eup %1925 }
  0xf9   :  { %v213_v21 = vadd.f32 1.0, %v1926_v19  ;;  %v1928_v24 = vpop.eup %1927 }
  0xfb   :  { %1929 = vrcp.f32 %v213_v21 }
 0x105   :  { %v1930_v25 = vpop.eup %1929 }
 0x106   :  { %v216_v26 = vsel %vm2233_vm5, %v1928_v24, %v1930_v25 }
 0x107   :  { %223 = vrot.lane.b32.xlu0 %v216_v26, %s2127_s18 }
 0x10b   :  { %218 = vrot.lane.b32.xlu0 %v158_v27, %s2128_s19 }
 0x179   :  { %v224_v28 = vpop.permute.xlu0 %223 }
 0x17a   :  { %v226_v29 = vmul.f32 %v224_v28, %v216_v26 }
 0x17c   :  { %228 = vrot.lane.b32.xlu1 %v226_v29, %s2128_s19 }
 0x17d   :  { %v219_v30 = vpop.permute.xlu0 %218 }
 0x17e   :  { %v221_v31 = vmul.f32 %v219_v30, %v216_v26 }
 0x1ee   :  { %v229_v32 = vpop.permute.xlu1 %228 }
 0x1ef   :  { %v2242_v33 = vadd.f32 %v229_v32, %v221_v31 }
 0x1f1   :  { %1931 = vtanh.f32 %v2242_v33 }
 0x1fb   :  { %v1932_v34 = vpop.eup %1931 }
 0x1fc   :  { %234 = vrot.lane.b32.xlu1 %v1932_v34, %s2127_s18 }
 0x26e   :  { %v235_v38 = vpop.permute.xlu1 %234 }
 0x26f   :  { %v237_v39 = vmul.f32 %v235_v38, %v216_v26 }
 0x271   :  { %1933 = vtanh.f32 %v237_v39 }
 0x27b   :  { %v1934_v42 = vpop.eup %1933 }
 0x27c   :  { %v1918_v43 = vpack.i.bf16 %v159_v41, %v1934_v42  ;;  %v344_v44 = vpack.c.bf16 %v1934_v42, %v1934_v42 }
 0x27e   :  { %1919 = vrot.lane.b32.xlu0 %v1918_v43, %s2128_s19  ;;  %346 = vrot.lane.b32.xlu1 %v344_v44, %s2128_s19 }
 0x2f0   :  { %v1920_v45 = vpop.permute.xlu0 %1919  ;;  %v347_v46 = vpop.permute.xlu1 %346 }
 0x2f1   :  { %v1922_v47 = vunpack.i.h.bf16 %v1920_v45  ;;  %v1921_v48 = vunpack.i.l.bf16 %v1920_v45  ;;  %1766 = vmatmul.mubr.msk.bf16.vlgmr.msra.gmra.mrb[0].mxu0 %vm164_vm2, %v347_v46  ;;  %v1640_v46 = vld [vmem:[%s2643_s2 + $0x8] sm:$0xf] }
 0x2f2   :  { %1770 = vmatpush3.bf16.msra.mxu0 %v2246_v35  ;;  %1777 = vmatprep.mubr.msk.bf16.mxu0 %vm2126_vm1, %v2125_v8 }
 0x2f3   :  { %v247_v49 = vsel %vm164_vm2, %v1921_v48, %v1922_v47  ;;  %1771 = vmatprep.subr.bf16.mxu0 %v2125_v8 }
 0x2f4   :  { %v248_v50 = vpack.c.bf16 %v247_v49, %v247_v49 }
 0x2f6   :  { %1758 = vmatmul.mubr.msk.bf16.vlgmr.msra.gmra.mrb[4].mxu1 %vm255_vm6, %v248_v50  ;;  %1772 = vmatpush3.bf16.msra.mxu0 %v2250_v36 }
 0x2f7   :  { %1782 = vmatpush3.bf16.msra.mxu1 %v2209_v7  ;;  %1773 = vmatprep.subr.bf16.mxu0 %v2125_v8 }
 0x2f8   :  { %1783 = vmatprep.subr.bf16.mxu1 %v2125_v8  ;;  %1785 = vmatprep.mubr.msk.bf16.mxu1 %vm2126_vm1, %v2125_v8 }
 0x2fa   :  { %1774 = vmatpush3.bf16.msra.mxu0 %v2254_v37 }
 0x2fb   :  { %1784 = vmatpush3.bf16.msra.mxu1 %v2217_v10  ;;  %1775 = vmatprep.subr.bf16.mxu0 %v2125_v8 }
 0x2fc   :  { %1789 = vmatprep.subr.bf16.mxu1 %v2125_v8 }
 0x2fe   :  { %1776 = vmatpush3.bf16.msra.mxu0 %v2258_v40 }
 0x2ff   :  { %1801 = vmatprep.subr.bf16.mxu0 %v2125_v8 }
 0x3c4   :  { %v385_v52 = vpop.f32.mrb[0].mxu0 }
 0x3c5   :  { %v391_v53 = vadd.f32 %v1635_v51, %v385_v52  ;;  %v1767_v54 = vpop.f32.mrb[1].mxu0 }
 0x3c6   :  { %v388_v55 = vpop.f32.mrb[2].mxu0 }
 0x3c7   :  { %v1637_v56 = vmul.f32 -1.442695, %v391_v53  ;;  %v1768_v57 = vpop.f32.mrb[3].mxu0 }
 0x3c9   :  { %1935 = vpow2.f32 %v1637_v56  ;;  %v293_v59 = vpop.f32.mrb[4].mxu1 }
 0x3ca   :  { %v294_v60 = vadd.f32 %v2289_v58, %v293_v59  ;;  %v1759_v61 = vpop.f32.mrb[5].mxu1 }
 0x3cb   :  { %v296_v62 = vpop.f32.mrb[6].mxu1 }
 0x3cc   :  { %v1634_v63 = vmul.f32 -1.442695, %v294_v60  ;;  %v1760_v0 = vpop.f32.mrb[7].mxu1 }
 0x3ce   :  { %1937 = vpow2.f32 %v1634_v63 }
 0x3cf   :  { %1939 = vtanh.f32 %v391_v53 }
 0x3d3   :  { %v1936_v1 = vpop.eup %1935 }
 0x3d4   :  { %v396_v2 = vadd.f32 1.0, %v1936_v1 }
 0x3d6   :  { %1941 = vrcp.f32 %v396_v2 }
 0x3d7   :  { %1943 = vtanh.f32 %v294_v60 }
 0x3d8   :  { %v1938_v3 = vpop.eup %1937 }
 0x3d9   :  { %v303_v4 = vadd.f32 1.0, %v1938_v3  ;;  %v1940_v5 = vpop.eup %1939 }
 0x3db   :  { %1945 = vrcp.f32 %v303_v4 }
 0x3e0   :  { %v1942_v9 = vpop.eup %1941 }
 0x3e1   :  { %v399_v11 = vsel %vm2233_vm5, %v1940_v5, %v1942_v9  ;;  %v1944_v12 = vpop.eup %1943 }
 0x3e2   :  { %402 = vrot.lane.b32.xlu1 %v399_v11, %s2127_s18  ;;  %v400_v21 = vmul.f32 %v399_v11, %v2242_v33 }
 0x3e5   :  { %v1946_v13 = vpop.eup %1945 }
 0x3e6   :  { %v306_v14 = vsel %vm2233_vm5, %v1944_v12, %v1946_v13 }
 0x3e7   :  { %313 = vrot.lane.b32.xlu0 %v306_v14, %s2127_s18 }
 0x3eb   :  { %308 = vrot.lane.b32.xlu0 %v160_v15, %s2128_s19 }
 0x454   :  { %v403_v16 = vpop.permute.xlu1 %402 }
 0x455   :  { %v405_v17 = vmul.f32 %v403_v16, %v399_v11 }
 0x457   :  { %407 = vrot.lane.b32.xlu0 %v405_v17, %s2128_s19 }
 0x459   :  { %v314_v18 = vpop.permute.xlu0 %313 }
 0x45a   :  { %v316_v19 = vmul.f32 %v314_v18, %v306_v14 }
 0x45c   :  { %318 = vrot.lane.b32.xlu1 %v316_v19, %s2128_s19 }
 0x45d   :  { %v309_v20 = vpop.permute.xlu0 %308 }
 0x45e   :  { %v311_v25 = vmul.f32 %v309_v20, %v306_v14 }
 0x4c9   :  { %v408_v22 = vpop.permute.xlu0 %407 }
 0x4ca   :  { %v2302_v24 = vadd.f32 %v408_v22, %v400_v21 }
 0x4cc   :  { %1947 = vtanh.f32 %v2302_v24 }
 0x4ce   :  { %v319_v26 = vpop.permute.xlu1 %318 }
 0x4cf   :  { %v2305_v27 = vadd.f32 %v319_v26, %v311_v25 }
 0x4d1   :  { %1949 = vtanh.f32 %v2305_v27 }
 0x4d6   :  { %v1948_v28 = vpop.eup %1947 }
 0x4d7   :  { %413 = vrot.lane.b32.xlu0 %v1948_v28, %s2127_s18 }
 0x4db   :  { %v1950_v29 = vpop.eup %1949 }
 0x4dc   :  { %324 = vrot.lane.b32.xlu1 %v1950_v29, %s2127_s18 }
 0x549   :  { %v414_v30 = vpop.permute.xlu0 %413 }
 0x54a   :  { %v416_v31 = vmul.f32 %v414_v30, %v399_v11 }
 0x54c   :  { %1951 = vtanh.f32 %v416_v31 }
 0x54e   :  { %v325_v32 = vpop.permute.xlu1 %324 }
 0x54f   :  { %v327_v33 = vmul.f32 %v325_v32, %v306_v14 }
 0x551   :  { %1953 = vtanh.f32 %v327_v33 }
 0x556   :  { %v1952_v34 = vpop.eup %1951 }
 0x557   :  { %419 = vrot.lane.b32.xlu1 %v1952_v34, %s2128_s19  ;;  %v508_v38 = vpack.c.bf16 %v1952_v34, %v1952_v34 }
 0x55b   :  { %v2311_v39 = vpop.eup %1953  ;;  %510 = vrot.lane.b32.xlu1 %v508_v38, %s2128_s19  ;;  %v1645_v38 = vld [vmem:[%s2643_s2 + $0xc] sm:$0xf] }
 0x55c   :  { %423 = vrot.lane.b32.xlu0 %v2311_v39, %s2127_s18 }
 0x5c9   :  { %v420_v41 = vpop.permute.xlu1 %419 }
 0x5cd   :  { %v511_v42 = vpop.permute.xlu1 %510 }
 0x5ce   :  { %1786 = vmatmul.mubr.msk.bf16.vlgmr.msra.gmra.mrb[8].mxu1 %vm164_vm2, %v511_v42  ;;  %v424_v43 = vpop.permute.xlu0 %423 }
 0x5cf   :  { %v426_v44 = vsel %vm164_vm2, %v420_v41, %v424_v43  ;;  %1790 = vmatpush3.bf16.msra.mxu1 %v2246_v35  ;;  %1797 = vmatprep.mubr.msk.bf16.mxu1 %vm2126_vm1, %v2125_v8 }
 0x5d0   :  { %v427_v45 = vpack.c.bf16 %v426_v44, %v426_v44  ;;  %1791 = vmatprep.subr.bf16.mxu1 %v2125_v8 }
 0x5d2   :  { %1778 = vmatmul.mubr.msk.bf16.vlgmr.msra.gmra.mrb[4].mxu0 %vm255_vm6, %v427_v45 }
 0x5d3   :  { %1792 = vmatpush3.bf16.msra.mxu1 %v2250_v36  ;;  %1802 = vmatpush3.bf16.msra.mxu0 %v2209_v7 }
 0x5d4   :  { %1793 = vmatprep.subr.bf16.mxu1 %v2125_v8  ;;  %1803 = vmatprep.subr.bf16.mxu0 %v2125_v8 }
 0x5d5   :  { %1805 = vmatprep.mubr.msk.bf16.mxu0 %vm2126_vm1, %v2125_v8 }
 0x5d7   :  { %1794 = vmatpush3.bf16.msra.mxu1 %v2254_v37  ;;  %1804 = vmatpush3.bf16.msra.mxu0 %v2217_v10 }
 0x5d8   :  { %1795 = vmatprep.subr.bf16.mxu1 %v2125_v8  ;;  %1809 = vmatprep.subr.bf16.mxu0 %v2125_v8 }
 0x5db   :  { %1796 = vmatpush3.bf16.msra.mxu1 %v2258_v40 }
 0x5dc   :  { %1821 = vmatprep.subr.bf16.mxu1 %v2125_v8 }
 0x6a1   :  { %v549_v47 = vpop.f32.mrb[8].mxu1 }
 0x6a2   :  { %v555_v48 = vadd.f32 %v1640_v46, %v549_v47  ;;  %v1787_v49 = vpop.f32.mrb[9].mxu1 }
 0x6a3   :  { %v552_v50 = vpop.f32.mrb[10].mxu1 }
 0x6a4   :  { %v1642_v51 = vmul.f32 -1.442695, %v555_v48  ;;  %v1788_v52 = vpop.f32.mrb[11].mxu1 }
 0x6a5   :  { %v465_v53 = vpop.f32.mrb[4].mxu0 }
 0x6a6   :  { %1955 = vpow2.f32 %v1642_v51  ;;  %v466_v54 = vadd.f32 %v2289_v58, %v465_v53  ;;  %v1779_v55 = vpop.f32.mrb[5].mxu0 }
 0x6a7   :  { %v468_v56 = vpop.f32.mrb[6].mxu0 }
 0x6a8   :  { %v1639_v57 = vmul.f32 -1.442695, %v466_v54  ;;  %v1780_v59 = vpop.f32.mrb[7].mxu0 }
 0x6aa   :  { %1957 = vpow2.f32 %v1639_v57 }
 0x6ab   :  { %1959 = vtanh.f32 %v555_v48 }
 0x6b0   :  { %v1956_v60 = vpop.eup %1955 }
 0x6b1   :  { %v560_v61 = vadd.f32 1.0, %v1956_v60 }
 0x6b3   :  { %1961 = vrcp.f32 %v560_v61 }
 0x6b4   :  { %v1958_v62 = vpop.eup %1957  ;;  %1963 = vtanh.f32 %v466_v54 }
 0x6b5   :  { %v475_v63 = vadd.f32 1.0, %v1958_v62  ;;  %v1960_v0 = vpop.eup %1959 }
 0x6b7   :  { %1965 = vrcp.f32 %v475_v63 }
 0x6bd   :  { %v1962_v1 = vpop.eup %1961 }
 0x6be   :  { %v563_v2 = vsel %vm2233_vm5, %v1960_v0, %v1962_v1  ;;  %v1964_v3 = vpop.eup %1963 }
 0x6bf   :  { %566 = vrot.lane.b32.xlu1 %v563_v2, %s2127_s18  ;;  %v564_v14 = vmul.f32 %v563_v2, %v2302_v24 }
 0x6c1   :  { %v1966_v4 = vpop.eup %1965 }
 0x6c2   :  { %v478_v5 = vsel %vm2233_vm5, %v1964_v3, %v1966_v4 }
 0x6c3   :  { %481 = vrot.lane.b32.xlu0 %v478_v5, %s2127_s18  ;;  %v479_v17 = vmul.f32 %v478_v5, %v2305_v27 }
 0x731   :  { %v567_v9 = vpop.permute.xlu1 %566 }
 0x732   :  { %v569_v11 = vmul.f32 %v567_v9, %v563_v2 }
 0x734   :  { %571 = vrot.lane.b32.xlu1 %v569_v11, %s2128_s19 }
 0x735   :  { %v482_v12 = vpop.permute.xlu0 %481 }
 0x736   :  { %v484_v13 = vmul.f32 %v482_v12, %v478_v5 }
 0x738   :  { %486 = vrot.lane.b32.xlu0 %v484_v13, %s2128_s19 }
 0x7a6   :  { %v572_v15 = vpop.permute.xlu1 %571 }
 0x7a7   :  { %v2348_v16 = vadd.f32 %v572_v15, %v564_v14 }
 0x7a9   :  { %1967 = vtanh.f32 %v2348_v16 }
 0x7aa   :  { %v487_v18 = vpop.permute.xlu0 %486 }
 0x7ab   :  { %v2352_v19 = vadd.f32 %v487_v18, %v479_v17 }
 0x7ad   :  { %1969 = vtanh.f32 %v2352_v19 }
 0x7b3   :  { %v1968_v20 = vpop.eup %1967 }
 0x7b4   :  { %577 = vrot.lane.b32.xlu1 %v1968_v20, %s2127_s18 }
 0x7b7   :  { %v1970_v21 = vpop.eup %1969 }
 0x7b8   :  { %492 = vrot.lane.b32.xlu0 %v1970_v21, %s2127_s18 }
 0x826   :  { %v578_v22 = vpop.permute.xlu1 %577 }
 0x827   :  { %v580_v24 = vmul.f32 %v578_v22, %v563_v2 }
 0x829   :  { %1971 = vtanh.f32 %v580_v24 }
 0x82a   :  { %v493_v25 = vpop.permute.xlu0 %492 }
 0x82b   :  { %v495_v26 = vmul.f32 %v493_v25, %v478_v5 }
 0x82d   :  { %1973 = vtanh.f32 %v495_v26 }
 0x833   :  { %v1972_v28 = vpop.eup %1971 }
 0x834   :  { %583 = vrot.lane.b32.xlu0 %v1972_v28, %s2128_s19  ;;  %v672_v27 = vpack.c.bf16 %v1972_v28, %v1972_v28 }
 0x837   :  { %v2358_v29 = vpop.eup %1973 }
 0x838   :  { %587 = vrot.lane.b32.xlu1 %v2358_v29, %s2127_s18  ;;  %674 = vrot.lane.b32.xlu0 %v672_v27, %s2128_s19 }
 0x8a6   :  { %v584_v30 = vpop.permute.xlu0 %583 }
 0x8aa   :  { %v675_v31 = vpop.permute.xlu0 %674  ;;  %v588_v32 = vpop.permute.xlu1 %587 }
 0x8ab   :  { %v590_v33 = vsel %vm164_vm2, %v584_v30, %v588_v32  ;;  %1806 = vmatmul.mubr.msk.bf16.vlgmr.msra.gmra.mrb[8].mxu0 %vm164_vm2, %v675_v31  ;;  %v1650_v30 = vld [vmem:[%s2643_s2 + $0x10] sm:$0xf] }
 0x8ac   :  { %v591_v34 = vpack.c.bf16 %v590_v33, %v590_v33  ;;  %1810 = vmatpush3.bf16.msra.mxu0 %v2246_v35  ;;  %1817 = vmatprep.mubr.msk.bf16.mxu0 %vm2126_vm1, %v2125_v8 }
 0x8ad   :  { %1811 = vmatprep.subr.bf16.mxu0 %v2125_v8 }
 0x8ae   :  { %1798 = vmatmul.mubr.msk.bf16.vlgmr.msra.gmra.mrb[12].mxu1 %vm255_vm6, %v591_v34 }
 0x8af   :  { %1822 = vmatpush3.bf16.msra.mxu1 %v2209_v7  ;;  %1825 = vmatprep.mubr.msk.bf16.mxu1 %vm2126_vm1, %v2125_v8 }
 0x8b0   :  { %1812 = vmatpush3.bf16.msra.mxu0 %v2250_v36  ;;  %1823 = vmatprep.subr.bf16.mxu1 %v2125_v8 }
 0x8b1   :  { %1813 = vmatprep.subr.bf16.mxu0 %v2125_v8 }
 0x8b3   :  { %1824 = vmatpush3.bf16.msra.mxu1 %v2217_v10 }
 0x8b4   :  { %1814 = vmatpush3.bf16.msra.mxu0 %v2254_v37  ;;  %1829 = vmatprep.subr.bf16.mxu1 %v2125_v8 }
 0x8b5   :  { %1815 = vmatprep.subr.bf16.mxu0 %v2125_v8 }
 0x8b8   :  { %1816 = vmatpush3.bf16.msra.mxu0 %v2258_v40 }
 0x8b9   :  { %1841 = vmatprep.subr.bf16.mxu0 %v2125_v8 }
 0x97e   :  { %v713_v41 = vpop.f32.mrb[8].mxu0 }
 0x97f   :  { %v719_v42 = vadd.f32 %v1645_v38, %v713_v41  ;;  %v1807_v43 = vpop.f32.mrb[9].mxu0 }
 0x980   :  { %v716_v44 = vpop.f32.mrb[10].mxu0 }
 0x981   :  { %v1647_v45 = vmul.f32 -1.442695, %v719_v42  ;;  %v629_v46 = vpop.f32.mrb[12].mxu1  ;;  %v1808_v47 = vpop.f32.mrb[11].mxu0 }
 0x982   :  { %v630_v48 = vadd.f32 %v2289_v58, %v629_v46  ;;  %v1799_v49 = vpop.f32.mrb[13].mxu1 }
 0x983   :  { %1975 = vpow2.f32 %v1647_v45  ;;  %v632_v50 = vpop.f32.mrb[14].mxu1 }
 0x984   :  { %v1644_v51 = vmul.f32 -1.442695, %v630_v48  ;;  %v1800_v52 = vpop.f32.mrb[15].mxu1 }
 0x986   :  { %1977 = vpow2.f32 %v1644_v51 }
 0x987   :  { %1979 = vtanh.f32 %v719_v42 }
 0x98d   :  { %v1976_v53 = vpop.eup %1975 }
 0x98e   :  { %v724_v54 = vadd.f32 1.0, %v1976_v53 }
 0x990   :  { %v1978_v55 = vpop.eup %1977  ;;  %1981 = vrcp.f32 %v724_v54 }
 0x991   :  { %v639_v56 = vadd.f32 1.0, %v1978_v55  ;;  %1983 = vtanh.f32 %v630_v48  ;;  %v1980_v57 = vpop.eup %1979 }
 0x993   :  { %1985 = vrcp.f32 %v639_v56 }
 0x99a   :  { %v1982_v59 = vpop.eup %1981 }
 0x99b   :  { %v727_v60 = vsel %vm2233_vm5, %v1980_v57, %v1982_v59  ;;  %v1984_v61 = vpop.eup %1983 }
 0x99c   :  { %730 = vrot.lane.b32.xlu0 %v727_v60, %s2127_s18  ;;  %v728_v4 = vmul.f32 %v727_v60, %v2348_v16 }
 0x99d   :  { %v1986_v62 = vpop.eup %1985 }
 0x99e   :  { %v642_v63 = vsel %vm2233_vm5, %v1984_v61, %v1986_v62 }
 0x99f   :  { %645 = vrot.lane.b32.xlu1 %v642_v63, %s2127_s18  ;;  %v643_v11 = vmul.f32 %v642_v63, %v2352_v19 }
 0xa0e   :  { %v731_v0 = vpop.permute.xlu0 %730 }
 0xa0f   :  { %v733_v1 = vmul.f32 %v731_v0, %v727_v60 }
 0xa11   :  { %735 = vrot.lane.b32.xlu0 %v733_v1, %s2128_s19  ;;  %v646_v2 = vpop.permute.xlu1 %645 }
 0xa12   :  { %v648_v3 = vmul.f32 %v646_v2, %v642_v63 }
 0xa14   :  { %650 = vrot.lane.b32.xlu1 %v648_v3, %s2128_s19 }
 0xa83   :  { %v736_v5 = vpop.permute.xlu0 %735 }
 0xa84   :  { %v2395_v9 = vadd.f32 %v736_v5, %v728_v4 }
 0xa86   :  { %1987 = vtanh.f32 %v2395_v9  ;;  %v651_v12 = vpop.permute.xlu1 %650 }
 0xa87   :  { %v2399_v13 = vadd.f32 %v651_v12, %v643_v11 }
 0xa89   :  { %1989 = vtanh.f32 %v2399_v13 }
 0xa90   :  { %v1988_v14 = vpop.eup %1987 }
 0xa91   :  { %741 = vrot.lane.b32.xlu0 %v1988_v14, %s2127_s18 }
 0xa93   :  { %v1990_v15 = vpop.eup %1989 }
 0xa94   :  { %656 = vrot.lane.b32.xlu1 %v1990_v15, %s2127_s18 }
 0xb03   :  { %v742_v17 = vpop.permute.xlu0 %741 }
 0xb04   :  { %v744_v16 = vmul.f32 %v742_v17, %v727_v60 }
 0xb06   :  { %1991 = vtanh.f32 %v744_v16  ;;  %v657_v18 = vpop.permute.xlu1 %656 }
 0xb07   :  { %v659_v20 = vmul.f32 %v657_v18, %v642_v63 }
 0xb09   :  { %1993 = vtanh.f32 %v659_v20 }
 0xb10   :  { %v1992_v19 = vpop.eup %1991 }
 0xb11   :  { %747 = vrot.lane.b32.xlu1 %v1992_v19, %s2128_s19  ;;  %v836_v22 = vpack.c.bf16 %v1992_v19, %v1992_v19 }
 0xb13   :  { %v2405_v21 = vpop.eup %1993 }
 0xb14   :  { %751 = vrot.lane.b32.xlu0 %v2405_v21, %s2127_s18 }
 0xb15   :  { %838 = vrot.lane.b32.xlu1 %v836_v22, %s2128_s19 }
 0xb83   :  { %v748_v24 = vpop.permute.xlu1 %747 }
 0xb86   :  { %v752_v25 = vpop.permute.xlu0 %751 }
 0xb87   :  { %v754_v26 = vsel %vm164_vm2, %v748_v24, %v752_v25  ;;  %v839_v28 = vpop.permute.xlu1 %838  ;;  %v1655_v25 = vld [vmem:[%s2643_s2 + $0x14] sm:$0xf] }
 0xb88   :  { %v755_v27 = vpack.c.bf16 %v754_v26, %v754_v26  ;;  %1826 = vmatmul.mubr.msk.bf16.vlgmr.msra.gmra.mrb[16].mxu1 %vm164_vm2, %v839_v28 }
 0xb89   :  { %1830 = vmatpush3.bf16.msra.mxu1 %v2246_v35  ;;  %1837 = vmatprep.mubr.msk.bf16.mxu1 %vm2126_vm1, %v2125_v8 }
 0xb8a   :  { %1818 = vmatmul.mubr.msk.bf16.vlgmr.msra.gmra.mrb[12].mxu0 %vm255_vm6, %v755_v27  ;;  %1831 = vmatprep.subr.bf16.mxu1 %v2125_v8 }
 0xb8b   :  { %1842 = vmatpush3.bf16.msra.mxu0 %v2209_v7  ;;  %1845 = vmatprep.mubr.msk.bf16.mxu0 %vm2126_vm1, %v2125_v8 }
 0xb8c   :  { %1843 = vmatprep.subr.bf16.mxu0 %v2125_v8 }
 0xb8d   :  { %1832 = vmatpush3.bf16.msra.mxu1 %v2250_v36 }
 0xb8e   :  { %1833 = vmatprep.subr.bf16.mxu1 %v2125_v8 }
 0xb8f   :  { %1844 = vmatpush3.bf16.msra.mxu0 %v2217_v10 }
 0xb90   :  { %1849 = vmatprep.subr.bf16.mxu0 %v2125_v8 }
 0xb91   :  { %1834 = vmatpush3.bf16.msra.mxu1 %v2254_v37 }
 0xb92   :  { %1835 = vmatprep.subr.bf16.mxu1 %v2125_v8 }
 0xb95   :  { %1836 = vmatpush3.bf16.msra.mxu1 %v2258_v40 }
 0xb96   :  { %1861 = vmatprep.subr.bf16.mxu1 %v2125_v8 }
 0xc5b   :  { %v877_v31 = vpop.f32.mrb[16].mxu1 }
 0xc5c   :  { %v883_v32 = vadd.f32 %v1650_v30, %v877_v31  ;;  %v1827_v33 = vpop.f32.mrb[17].mxu1 }
 0xc5d   :  { %v793_v34 = vpop.f32.mrb[12].mxu0  ;;  %v880_v38 = vpop.f32.mrb[18].mxu1 }
 0xc5e   :  { %v1652_v41 = vmul.f32 -1.442695, %v883_v32  ;;  %v794_v42 = vadd.f32 %v2289_v58, %v793_v34  ;;  %v1819_v43 = vpop.f32.mrb[13].mxu0  ;;  %v1828_v44 = vpop.f32.mrb[19].mxu1 }
 0xc5f   :  { %v796_v45 = vpop.f32.mrb[14].mxu0 }
 0xc60   :  { %1995 = vpow2.f32 %v1652_v41  ;;  %v1649_v46 = vmul.f32 -1.442695, %v794_v42  ;;  %v1820_v47 = vpop.f32.mrb[15].mxu0 }
 0xc62   :  { %1997 = vpow2.f32 %v1649_v46 }
 0xc63   :  { %1999 = vtanh.f32 %v883_v32 }
 0xc6a   :  { %v1996_v48 = vpop.eup %1995 }
 0xc6b   :  { %v888_v49 = vadd.f32 1.0, %v1996_v48 }
 0xc6c   :  { %v1998_v50 = vpop.eup %1997 }
 0xc6d   :  { %2001 = vrcp.f32 %v888_v49  ;;  %v803_v51 = vadd.f32 1.0, %v1998_v50  ;;  %v2000_v52 = vpop.eup %1999 }
 0xc6e   :  { %2003 = vtanh.f32 %v794_v42 }
 0xc6f   :  { %2005 = vrcp.f32 %v803_v51 }
 0xc77   :  { %v2002_v53 = vpop.eup %2001 }
 0xc78   :  { %v2004_v54 = vpop.eup %2003  ;;  %v891_v55 = vsel %vm2233_vm5, %v2000_v52, %v2002_v53 }
 0xc79   :  { %v2006_v56 = vpop.eup %2005  ;;  %894 = vrot.lane.b32.xlu1 %v891_v55, %s2127_s18  ;;  %v892_v63 = vmul.f32 %v891_v55, %v2395_v9 }
 0xc7a   :  { %v806_v57 = vsel %vm2233_vm5, %v2004_v54, %v2006_v56 }
 0xc7b   :  { %809 = vrot.lane.b32.xlu0 %v806_v57, %s2127_s18  ;;  %v807_v2 = vmul.f32 %v806_v57, %v2399_v13 }
 0xceb   :  { %v895_v59 = vpop.permute.xlu1 %894 }
 0xcec   :  { %v897_v60 = vmul.f32 %v895_v59, %v891_v55 }
 0xced   :  { %v810_v61 = vpop.permute.xlu0 %809 }
 0xcee   :  { %v812_v62 = vmul.f32 %v810_v61, %v806_v57  ;;  %899 = vrot.lane.b32.xlu1 %v897_v60, %s2128_s19 }
 0xcf0   :  { %814 = vrot.lane.b32.xlu0 %v812_v62, %s2128_s19 }
 0xd60   :  { %v900_v0 = vpop.permute.xlu1 %899 }
 0xd61   :  { %v2442_v1 = vadd.f32 %v900_v0, %v892_v63 }
 0xd62   :  { %v815_v3 = vpop.permute.xlu0 %814 }
 0xd63   :  { %2007 = vtanh.f32 %v2442_v1  ;;  %v2446_v4 = vadd.f32 %v815_v3, %v807_v2 }
 0xd65   :  { %2009 = vtanh.f32 %v2446_v4 }
 0xd6d   :  { %v2008_v5 = vpop.eup %2007 }
 0xd6e   :  { %905 = vrot.lane.b32.xlu1 %v2008_v5, %s2127_s18 }
 0xd6f   :  { %v2010_v11 = vpop.eup %2009 }
 0xd70   :  { %820 = vrot.lane.b32.xlu0 %v2010_v11, %s2127_s18 }
 0xde0   :  { %v906_v12 = vpop.permute.xlu1 %905 }
 0xde1   :  { %v908_v9 = vmul.f32 %v906_v12, %v891_v55 }
 0xde2   :  { %v821_v14 = vpop.permute.xlu0 %820 }
 0xde3   :  { %2011 = vtanh.f32 %v908_v9  ;;  %v823_v15 = vmul.f32 %v821_v14, %v806_v57 }
 0xde5   :  { %2013 = vtanh.f32 %v823_v15 }
 0xded   :  { %v2012_v13 = vpop.eup %2011 }
 0xdee   :  { %911 = vrot.lane.b32.xlu0 %v2012_v13, %s2128_s19  ;;  %v1000_v16 = vpack.c.bf16 %v2012_v13, %v2012_v13 }
 0xdef   :  { %v2452_v17 = vpop.eup %2013 }
 0xdf0   :  { %915 = vrot.lane.b32.xlu1 %v2452_v17, %s2127_s18 }
 0xdf2   :  { %1002 = vrot.lane.b32.xlu0 %v1000_v16, %s2128_s19 }
 0xe60   :  { %v912_v18 = vpop.permute.xlu0 %911 }
 0xe62   :  { %v916_v20 = vpop.permute.xlu1 %915 }
 0xe63   :  { %v918_v19 = vsel %vm164_vm2, %v912_v18, %v916_v20 }
 0xe64   :  { %v919_v22 = vpack.c.bf16 %v918_v19, %v918_v19  ;;  %v1003_v24 = vpop.permute.xlu0 %1002 }
 0xe65   :  { %1846 = vmatmul.mubr.msk.bf16.vlgmr.msra.gmra.mrb[16].mxu0 %vm164_vm2, %v1003_v24 }
 0xe66   :  { %1838 = vmatmul.mubr.msk.bf16.vlgmr.msra.gmra.mrb[20].mxu1 %vm255_vm6, %v919_v22  ;;  %1850 = vmatpush3.bf16.msra.mxu0 %v2246_v35 }
 0xe67   :  { %1851 = vmatprep.subr.bf16.mxu0 %v2125_v8  ;;  %1862 = vmatpush3.bf16.msra.mxu1 %v2209_v7 }
 0xe68   :  { %1863 = vmatprep.subr.bf16.mxu1 %v2125_v8  ;;  %1857 = vmatprep.mubr.msk.bf16.mxu0 %vm2126_vm1, %v2125_v8 }
 0xe69   :  { %1865 = vmatprep.mubr.msk.bf16.mxu1 %vm2126_vm1, %v2125_v8 }
 0xe6a   :  { %1852 = vmatpush3.bf16.msra.mxu0 %v2250_v36 }
 0xe6b   :  { %1853 = vmatprep.subr.bf16.mxu0 %v2125_v8  ;;  %1864 = vmatpush3.bf16.msra.mxu1 %v2217_v10 }
 0xe6c   :  { %1869 = vmatprep.subr.bf16.mxu1 %v2125_v8 }
 0xe6e   :  { %1854 = vmatpush3.bf16.msra.mxu0 %v2254_v37 }
 0xe6f   :  { %1855 = vmatprep.subr.bf16.mxu0 %v2125_v8 }
 0xe72   :  { %1856 = vmatpush3.bf16.msra.mxu0 %v2258_v40 }
 0xe73   :  { %1881 = vmatprep.subr.bf16.mxu0 %v2125_v8 }
 0xf38   :  { %v1041_v26 = vpop.f32.mrb[16].mxu0 }
 0xf39   :  { %v1047_v28 = vadd.f32 %v1655_v25, %v1041_v26  ;;  %v957_v27 = vpop.f32.mrb[20].mxu1  ;;  %v1847_v30 = vpop.f32.mrb[17].mxu0 }
 0xf3a   :  { %v958_v31 = vadd.f32 %v2289_v58, %v957_v27  ;;  %v1839_v32 = vpop.f32.mrb[21].mxu1  ;;  %v1044_v33 = vpop.f32.mrb[18].mxu0 }
 0xf3b   :  { %v1657_v34 = vmul.f32 -1.442695, %v1047_v28  ;;  %v960_v38 = vpop.f32.mrb[22].mxu1  ;;  %v1848_v41 = vpop.f32.mrb[19].mxu0 }
 0xf3c   :  { %v1654_v42 = vmul.f32 -1.442695, %v958_v31  ;;  %v1840_v43 = vpop.f32.mrb[23].mxu1 }
 0xf3d   :  { %2015 = vpow2.f32 %v1657_v34 }
 0xf3e   :  { %2017 = vpow2.f32 %v1654_v42 }
 0xf3f   :  { %2019 = vtanh.f32 %v1047_v28 }
 0xf40   :  { %2021 = vtanh.f32 %v958_v31 }
 0xf47   :  { %v2016_v44 = vpop.eup %2015 }
 0xf48   :  { %v2018_v45 = vpop.eup %2017  ;;  %v1052_v46 = vadd.f32 1.0, %v2016_v44 }
 0xf49   :  { %v967_v47 = vadd.f32 1.0, %v2018_v45  ;;  %v2020_v48 = vpop.eup %2019 }
 0xf4a   :  { %2023 = vrcp.f32 %v1052_v46  ;;  %v2022_v49 = vpop.eup %2021 }
 0xf4b   :  { %2025 = vrcp.f32 %v967_v47 }
 0xf54   :  { %v2024_v50 = vpop.eup %2023 }
 0xf55   :  { %v2026_v51 = vpop.eup %2025  ;;  %v1055_v52 = vsel %vm2233_vm5, %v2020_v48, %v2024_v50 }
 0xf56   :  { %1058 = vrot.lane.b32.xlu0 %v1055_v52, %s2127_s18  ;;  %v970_v53 = vsel %vm2233_vm5, %v2022_v49, %v2026_v51  ;;  %v1056_v59 = vmul.f32 %v1055_v52, %v2442_v1 }
 0xf57   :  { %973 = vrot.lane.b32.xlu1 %v970_v53, %s2127_s18  ;;  %v971_v61 = vmul.f32 %v970_v53, %v2446_v4 }
 0xfc8   :  { %v1059_v54 = vpop.permute.xlu0 %1058 }
 0xfc9   :  { %v1061_v55 = vmul.f32 %v1059_v54, %v1055_v52  ;;  %v974_v56 = vpop.permute.xlu1 %973 }
 0xfca   :  { %v976_v57 = vmul.f32 %v974_v56, %v970_v53 }
 0xfcb   :  { %1063 = vrot.lane.b32.xlu0 %v1061_v55, %s2128_s19 }
 0xfcc   :  { %978 = vrot.lane.b32.xlu1 %v976_v57, %s2128_s19 }
0x103d   :  { %v1064_v60 = vpop.permute.xlu0 %1063 }
0x103e   :  { %v2490_v62 = vadd.f32 %v1064_v60, %v1056_v59  ;;  %v979_v63 = vpop.permute.xlu1 %978 }
0x103f   :  { %v2492_v0 = vadd.f32 %v979_v63, %v971_v61 }
0x1040   :  { %2027 = vtanh.f32 %v2490_v62 }
0x1041   :  { %2029 = vtanh.f32 %v2492_v0 }
0x104a   :  { %v2028_v2 = vpop.eup %2027 }
0x104b   :  { %v2030_v3 = vpop.eup %2029  ;;  %1069 = vrot.lane.b32.xlu0 %v2028_v2, %s2127_s18 }
0x104c   :  { %984 = vrot.lane.b32.xlu1 %v2030_v3, %s2127_s18 }
0x10bd   :  { %v1070_v5 = vpop.permute.xlu0 %1069 }
0x10be   :  { %v1072_v1 = vmul.f32 %v1070_v5, %v1055_v52  ;;  %v985_v11 = vpop.permute.xlu1 %984 }
0x10bf   :  { %v987_v12 = vmul.f32 %v985_v11, %v970_v53 }
0x10c0   :  { %2031 = vtanh.f32 %v1072_v1 }
0x10c1   :  { %2033 = vtanh.f32 %v987_v12  ;;  %v2085_v12 = vld [vmem:[#allocation3] sm:$0xff] }
0x10ca   :  { %v2032_v4 = vpop.eup %2031 }
0x10cb   :  { %v2498_v9 = vpop.eup %2033  ;;  %1075 = vrot.lane.b32.xlu1 %v2032_v4, %s2128_s19  ;;  %v1164_v14 = vpack.c.bf16 %v2032_v4, %v2032_v4  ;;  %v2086_v4 = vld [vmem:[#allocation3 + $0x8] sm:$0xff] }
0x10cc   :  { %1079 = vrot.lane.b32.xlu0 %v2498_v9, %s2127_s18 }
0x10cf   :  { %1166 = vrot.lane.b32.xlu1 %v1164_v14, %s2128_s19  ;;  %v2087_v14 = vld [vmem:[#allocation3 + $0x10] sm:$0xff] }
0x113d   :  { %v1076_v15 = vpop.permute.xlu1 %1075 }
0x113e   :  { %v1080_v13 = vpop.permute.xlu0 %1079 }
0x113f   :  { %v1082_v16 = vsel %vm164_vm2, %v1076_v15, %v1080_v13  ;;  %v2088_v15 = vld [vmem:[#allocation3 + $0x18] sm:$0xff]  ;;  %v1665_v13 = vld [vmem:[%s2643_s2 + $0x1c] sm:$0xf] }
0x1140   :  { %v1083_v18 = vpack.c.bf16 %v1082_v16, %v1082_v16 }
0x1141   :  { %v1167_v20 = vpop.permute.xlu1 %1166 }
0x1142   :  { %1858 = vmatmul.mubr.msk.bf16.vlgmr.msra.gmra.mrb[20].mxu0 %vm255_vm6, %v1083_v18  ;;  %1866 = vmatmul.mubr.msk.bf16.vlgmr.msra.gmra.mrb[24].mxu1 %vm164_vm2, %v1167_v20 }
0x1143   :  { %1870 = vmatpush3.bf16.msra.mxu1 %v2246_v35  ;;  %1882 = vmatpush3.bf16.msra.mxu0 %v2209_v7  ;;  %v1660_v7 = vld [vmem:[%s2643_s2 + $0x18] sm:$0xf] }
0x1144   :  { %1871 = vmatprep.subr.bf16.mxu1 %v2125_v8  ;;  %1883 = vmatprep.subr.bf16.mxu0 %v2125_v8 }
0x1145   :  { %1877 = vmatprep.mubr.msk.bf16.mxu1 %vm2126_vm1, %v2125_v8  ;;  %1885 = vmatprep.mubr.msk.bf16.mxu0 %vm2126_vm1, %v2125_v8 }
0x1147   :  { %1872 = vmatpush3.bf16.msra.mxu1 %v2250_v36  ;;  %1884 = vmatpush3.bf16.msra.mxu0 %v2217_v10 }
0x1148   :  { %1873 = vmatprep.subr.bf16.mxu1 %v2125_v8  ;;  %1889 = vmatprep.subr.bf16.mxu0 %v2125_v8 }
0x114b   :  { %1874 = vmatpush3.bf16.msra.mxu1 %v2254_v37 }
0x114c   :  { %1875 = vmatprep.subr.bf16.mxu1 %v2125_v8 }
0x114f   :  { %1876 = vmatpush3.bf16.msra.mxu1 %v2258_v40 }
0x1215   :  { %v1121_v35 = vpop.f32.mrb[20].mxu0  ;;  %v1205_v19 = vpop.f32.mrb[24].mxu1 }
0x1216   :  { %v1122_v36 = vadd.f32 %v2289_v58, %v1121_v35  ;;  %v1211_v22 = vadd.f32 %v1660_v7, %v1205_v19  ;;  %v1859_v10 = vpop.f32.mrb[21].mxu0  ;;  %v1867_v24 = vpop.f32.mrb[25].mxu1 }
0x1217   :  { %v1124_v25 = vpop.f32.mrb[22].mxu0  ;;  %v1208_v26 = vpop.f32.mrb[26].mxu1 }
0x1218   :  { %v1659_v28 = vmul.f32 -1.442695, %v1122_v36  ;;  %v1662_v27 = vmul.f32 -1.442695, %v1211_v22  ;;  %v1860_v37 = vpop.f32.mrb[23].mxu0  ;;  %v1868_v30 = vpop.f32.mrb[27].mxu1 }
0x121a   :  { %2035 = vpow2.f32 %v1659_v28 }
0x121b   :  { %2037 = vpow2.f32 %v1662_v27 }
0x121c   :  { %2039 = vtanh.f32 %v1122_v36 }
0x121d   :  { %2041 = vtanh.f32 %v1211_v22 }
0x1224   :  { %v2036_v40 = vpop.eup %2035 }
0x1225   :  { %v2038_v31 = vpop.eup %2037  ;;  %v1131_v32 = vadd.f32 1.0, %v2036_v40 }
0x1226   :  { %v1216_v33 = vadd.f32 1.0, %v2038_v31  ;;  %v2040_v34 = vpop.eup %2039 }
0x1227   :  { %2043 = vrcp.f32 %v1131_v32  ;;  %v2042_v38 = vpop.eup %2041 }
0x1228   :  { %2045 = vrcp.f32 %v1216_v33 }
0x1231   :  { %v2044_v41 = vpop.eup %2043 }
0x1232   :  { %v2046_v42 = vpop.eup %2045  ;;  %v1134_v43 = vsel %vm2233_vm5, %v2040_v34, %v2044_v41 }
0x1233   :  { %1137 = vrot.lane.b32.xlu0 %v1134_v43, %s2127_s18  ;;  %v1219_v44 = vsel %vm2233_vm5, %v2042_v38, %v2046_v42  ;;  %v1135_v49 = vmul.f32 %v1134_v43, %v2492_v0 }
0x1234   :  { %1222 = vrot.lane.b32.xlu1 %v1219_v44, %s2127_s18  ;;  %v1220_v51 = vmul.f32 %v1219_v44, %v2490_v62 }
0x12a5   :  { %v1138_v45 = vpop.permute.xlu0 %1137 }
0x12a6   :  { %v1140_v46 = vmul.f32 %v1138_v45, %v1134_v43  ;;  %v1223_v47 = vpop.permute.xlu1 %1222 }
0x12a7   :  { %v1225_v48 = vmul.f32 %v1223_v47, %v1219_v44 }
0x12a8   :  { %1142 = vrot.lane.b32.xlu0 %v1140_v46, %s2128_s19 }
0x12a9   :  { %1227 = vrot.lane.b32.xlu1 %v1225_v48, %s2128_s19 }
0x131a   :  { %v1143_v50 = vpop.permute.xlu0 %1142 }
0x131b   :  { %v2536_v52 = vadd.f32 %v1143_v50, %v1135_v49  ;;  %v1228_v53 = vpop.permute.xlu1 %1227 }
0x131c   :  { %v2538_v54 = vadd.f32 %v1228_v53, %v1220_v51 }
0x131d   :  { %2047 = vtanh.f32 %v2536_v52 }
0x131e   :  { %2049 = vtanh.f32 %v2538_v54 }
0x1327   :  { %v2048_v55 = vpop.eup %2047 }
0x1328   :  { %v2050_v56 = vpop.eup %2049  ;;  %1148 = vrot.lane.b32.xlu0 %v2048_v55, %s2127_s18 }
0x1329   :  { %1233 = vrot.lane.b32.xlu1 %v2050_v56, %s2127_s18 }
0x139a   :  { %v1149_v57 = vpop.permute.xlu0 %1148 }
0x139b   :  { %v1151_v59 = vmul.f32 %v1149_v57, %v1134_v43  ;;  %v1234_v60 = vpop.permute.xlu1 %1233 }
0x139c   :  { %v1236_v61 = vmul.f32 %v1234_v60, %v1219_v44 }
0x139d   :  { %2051 = vtanh.f32 %v1151_v59 }
0x139e   :  { %2053 = vtanh.f32 %v1236_v61 }
0x13a7   :  { %v2544_v62 = vpop.eup %2051 }
0x13a8   :  { %v2054_v63 = vpop.eup %2053  ;;  %1243 = vrot.lane.b32.xlu1 %v2544_v62, %s2127_s18 }
0x13a9   :  { %1239 = vrot.lane.b32.xlu0 %v2054_v63, %s2128_s19  ;;  %v1328_v0 = vpack.c.bf16 %v2054_v63, %v2054_v63 }
0x13ad   :  { %1330 = vrot.lane.b32.xlu0 %v1328_v0, %s2128_s19  ;;  %v2089_v0 = vld [vmem:[%s2644_s3] ss:$0 sm:$0xff] }
0x141a   :  { %v1244_v2 = vpop.permute.xlu1 %1243 }
0x141b   :  { %v1240_v3 = vpop.permute.xlu0 %1239 }
0x141c   :  { %v1246_v5 = vsel %vm164_vm2, %v1240_v3, %v1244_v2 }
0x141d   :  { %v1247_v1 = vpack.c.bf16 %v1246_v5, %v1246_v5 }
0x141f   :  { %v1331_v11 = vpop.permute.xlu0 %1330  ;;  %1878 = vmatmul.mubr.msk.bf16.vlgmr.msra.gmra.mrb[28].mxu1 %vm255_vm6, %v1247_v1 }
0x1420   :  { %1886 = vmatmul.mubr.msk.bf16.vlgmr.msra.gmra.mrb[24].mxu0 %vm164_vm2, %v1331_v11 }
0x1421   :  { %1890 = vmatpush3.bf16.msra.mxu0 %v2085_v12  ;;  %1897 = vmatprep.mubr.msk.bf16.mxu0 %vm2126_vm1, %v2125_v8 }
0x1422   :  { %1891 = vmatprep.subr.bf16.mxu0 %v2125_v8 }
0x1425   :  { %1892 = vmatpush3.bf16.msra.mxu0 %v2086_v4 }
0x1426   :  { %1893 = vmatprep.subr.bf16.mxu0 %v2125_v8 }
0x1429   :  { %1894 = vmatpush3.bf16.msra.mxu0 %v2087_v14  ;;  %v2129_v14 = vmov 0  }
0x142a   :  { %1895 = vmatprep.subr.bf16.mxu0 %v2125_v8  ;;  %1924 = vset.pattern.permute.xlu0 %v2129_v14 }
0x142b   :  { %1923 = vset.pattern.permute.xlu1 %v2129_v14 }
0x142d   :  { %1896 = vmatpush3.bf16.msra.mxu0 %v2088_v15 }
0x14f2   :  { %v1285_v16 = vpop.f32.mrb[28].mxu1 }
0x14f3   :  { %v1286_v18 = vadd.f32 %v2289_v58, %v1285_v16  ;;  %v1879_v20 = vpop.f32.mrb[29].mxu1  ;;  %v1369_v7 = vpop.f32.mrb[24].mxu0 }
0x14f4   :  { %v1375_v35 = vadd.f32 %v1665_v13, %v1369_v7  ;;  %v1288_v19 = vpop.f32.mrb[30].mxu1  ;;  %v1887_v36 = vpop.f32.mrb[25].mxu0 }
0x14f5   :  { %v1664_v22 = vmul.f32 -1.442695, %v1286_v18  ;;  %v1880_v10 = vpop.f32.mrb[31].mxu1  ;;  %v1372_v24 = vpop.f32.mrb[26].mxu0 }
0x14f6   :  { %v1667_v25 = vmul.f32 -1.442695, %v1375_v35  ;;  %v1888_v26 = vpop.f32.mrb[27].mxu0 }
0x14f7   :  { %2055 = vpow2.f32 %v1664_v22 }
0x14f8   :  { %2057 = vpow2.f32 %v1667_v25 }
0x14f9   :  { %2059 = vtanh.f32 %v1286_v18  ;;  %v151_v18 = vld [vmem:[%s2641_s0] sm:$0xf]  ;;  %s2130_s0 = smov 96  }
0x14fa   :  { %2061 = vtanh.f32 %v1375_v35  ;;  %vm330_vm7 = vcmp.eq.s32.totalorder %v151_v18, 0  ;;  %vm662_vm8 = vcmp.eq.s32.totalorder %v151_v18, 2  ;;  %vm990_vm9 = vcmp.eq.s32.totalorder %v151_v18, 4 }
0x14fb   :  { %v331_v20 = vsel %vm330_vm7, 1, %v2129_v14  ;;  %v663_v7 = vsel %vm662_vm8, 1, %v2129_v14  ;;  %v991_v35 = vsel %vm990_vm9, 1, %v2129_v14  ;;  %vm498_vm10 = vcmp.eq.s32.totalorder %v151_v18, 1 }
0x14fc   :  { %v499_v23 = vsel %vm498_vm10, 1, %v2129_v14  ;;  %vm826_vm11 = vcmp.eq.s32.totalorder %v151_v18, 3  ;;  %vm1154_vm12 = vcmp.eq.s32.totalorder %v151_v18, 5  ;;  %vm1482_vm13 = vcmp.eq.s32.totalorder %v151_v18, 7 }
0x14fd   :  { %v827_v22 = vsel %vm826_vm11, 1, %v2129_v14  ;;  %v1155_v10 = vsel %vm1154_vm12, 1, %v2129_v14  ;;  %v1483_v24 = vsel %vm1482_vm13, 1, %v2129_v14  ;;  %vm1318_vm14 = vcmp.eq.s32.totalorder %v151_v18, 6 }
0x1501   :  { %v2056_v8 = vpop.eup %2055 }
0x1502   :  { %v2058_v28 = vpop.eup %2057  ;;  %v1295_v27 = vadd.f32 1.0, %v2056_v8 }
0x1503   :  { %v1380_v37 = vadd.f32 1.0, %v2058_v28  ;;  %v2060_v58 = vpop.eup %2059 }
0x1504   :  { %2063 = vrcp.f32 %v1295_v27  ;;  %v2062_v30 = vpop.eup %2061  ;;  %v1319_v27 = vsel %vm1318_vm14, 1, %v2129_v14 }
0x1505   :  { %2065 = vrcp.f32 %v1380_v37 }
0x150e   :  { %v2064_v40 = vpop.eup %2063 }
0x150f   :  { %v2066_v31 = vpop.eup %2065  ;;  %v1298_v32 = vsel %vm2233_vm5, %v2060_v58, %v2064_v40  ;;  %v161_v58 = vld [vmem:[#allocation8] sm:$0xf] }
0x1510   :  { %1301 = vrot.lane.b32.xlu1 %v1298_v32, %s2127_s18  ;;  %v1383_v33 = vsel %vm2233_vm5, %v2062_v30, %v2066_v31  ;;  %v1299_v43 = vmul.f32 %v1298_v32, %v2536_v52 }
0x1511   :  { %1386 = vrot.lane.b32.xlu0 %v1383_v33, %s2127_s18  ;;  %v1384_v45 = vmul.f32 %v1383_v33, %v2538_v54 }
0x1582   :  { %v1302_v34 = vpop.permute.xlu1 %1301 }
0x1583   :  { %v1304_v38 = vmul.f32 %v1302_v34, %v1298_v32  ;;  %v1387_v41 = vpop.permute.xlu0 %1386 }
0x1584   :  { %v1389_v42 = vmul.f32 %v1387_v41, %v1383_v33 }
0x1585   :  { %1306 = vrot.lane.b32.xlu1 %v1304_v38, %s2128_s19 }
0x1586   :  { %1391 = vrot.lane.b32.xlu0 %v1389_v42, %s2128_s19 }
0x15f7   :  { %v1307_v44 = vpop.permute.xlu1 %1306 }
0x15f8   :  { %v2572_v46 = vadd.f32 %v1307_v44, %v1299_v43  ;;  %v1392_v47 = vpop.permute.xlu0 %1391 }
0x15f9   :  { %v2574_v48 = vadd.f32 %v1392_v47, %v1384_v45 }
0x15fa   :  { %2067 = vtanh.f32 %v2572_v46 }
0x15fb   :  { %2069 = vtanh.f32 %v2574_v48 }
0x1604   :  { %v2068_v49 = vpop.eup %2067 }
0x1605   :  { %v2070_v50 = vpop.eup %2069  ;;  %1312 = vrot.lane.b32.xlu1 %v2068_v49, %s2127_s18 }
0x1606   :  { %1397 = vrot.lane.b32.xlu0 %v2070_v50, %s2127_s18 }
0x1677   :  { %v1313_v51 = vpop.permute.xlu1 %1312 }
0x1678   :  { %v1315_v52 = vmul.f32 %v1313_v51, %v1298_v32  ;;  %v1398_v53 = vpop.permute.xlu0 %1397 }
0x1679   :  { %v1400_v55 = vmul.f32 %v1398_v53, %v1383_v33 }
0x167a   :  { %2071 = vtanh.f32 %v1315_v52 }
0x167b   :  { %2073 = vtanh.f32 %v1400_v55 }
0x1684   :  { %v2580_v54 = vpop.eup %2071 }
0x1685   :  { %v2074_v56 = vpop.eup %2073  ;;  %1407 = vrot.lane.b32.xlu0 %v2580_v54, %s2127_s18 }
0x1686   :  { %1403 = vrot.lane.b32.xlu1 %v2074_v56, %s2128_s19 }
0x16f7   :  { %v1408_v57 = vpop.permute.xlu0 %1407 }
0x16f8   :  { %v1404_v59 = vpop.permute.xlu1 %1403 }
0x16f9   :  { %v1410_v60 = vsel %vm164_vm2, %v1404_v59, %v1408_v57  ;;  %1490 = vst.msk [vmem:[#allocation4] sm:$0xf] %vm132_vm0, %v1404_v59 }
0x16fa   :  { %v1411_v61 = vpack.c.bf16 %v1410_v60, %v1410_v60 }
0x16fc   :  { %1898 = vmatmul.mubr.msk.bf16.vlgmr.msra.gmra.mrb[28].mxu0 %vm255_vm6, %v1411_v61 }
0x17cf   :  { %v1449_v63 = vpop.f32.mrb[28].mxu0 }
0x17d0   :  { %v1450_v2 = vadd.f32 %v2089_v0, %v1449_v63  ;;  %v1899_v3 = vpop.f32.mrb[29].mxu0 }
0x17d1   :  { %v1452_v5 = vpop.f32.mrb[30].mxu0 }
0x17d2   :  { %v1669_v1 = vmul.f32 -1.442695, %v1450_v2  ;;  %v1900_v11 = vpop.f32.mrb[31].mxu0 }
0x17d4   :  { %2075 = vpow2.f32 %v1669_v1 }
0x17d5   :  { %2077 = vtanh.f32 %v1450_v2 }
0x17de   :  { %v2076_v12 = vpop.eup %2075 }
0x17df   :  { %v1459_v4 = vadd.f32 1.0, %v2076_v12  ;;  %v2078_v15 = vpop.eup %2077 }
0x17e1   :  { %2079 = vrcp.f32 %v1459_v4 }
0x17eb   :  { %v2080_v13 = vpop.eup %2079 }
0x17ec   :  { %v1462_v16 = vsel %vm2233_vm5, %v2078_v15, %v2080_v13 }
0x17ed   :  { %1465 = vrot.lane.b32.xlu1 %v1462_v16, %s2127_s18  ;;  %v1463_v25 = vmul.f32 %v1462_v16, %v2572_v46 }
0x17f1   :  { %333 = vperm.xlu1 %1923, %v331_v20  }
0x17f5   :  { %665 = vperm.xlu1 %1923, %v663_v7  }
0x17f9   :  { %993 = vperm.xlu1 %1923, %v991_v35  }
0x185f   :  { %v1466_v19 = vpop.permute.xlu1 %1465 }
0x1860   :  { %v1468_v36 = vmul.f32 %v1466_v19, %v1462_v16 }
0x1862   :  { %1470 = vrot.lane.b32.xlu0 %v1468_v36, %s2128_s19 }
0x1866   :  { %501 = vperm.xlu0 %1924, %v499_v23  }
0x186a   :  { %829 = vperm.xlu0 %1924, %v827_v22  }
0x186e   :  { %1157 = vperm.xlu0 %1924, %v1155_v10  }
0x1870   :  { %v334_v33 = vpop.permute.xlu1 %333 }
0x1871   :  { %vm335_vm15 = vcmp.eq.s32.totalorder %v334_v33, 1 }
0x1872   :  { %1485 = vperm.xlu0 %1924, %v1483_v24  }
0x1874   :  { %v666_v34 = vpop.permute.xlu1 %665 }
0x1875   :  { %vm667_vm2 = vcmp.eq.s32.totalorder %v666_v34, 1 }
0x1876   :  { %1492 = vrot.lane.b32.xlu0 %v2574_v48, %s2130_s0 }
0x1878   :  { %v994_v41 = vpop.permute.xlu1 %993 }
0x1879   :  { %vm995_vm4 = vcmp.eq.s32.totalorder %v994_v41, 1 }
0x18d4   :  { %v1471_v26 = vpop.permute.xlu0 %1470 }
0x18d5   :  { %v1473_v8 = vadd.f32 %v1471_v26, %v1463_v25 }
0x18d7   :  { %2081 = vtanh.f32 %v1473_v8  ;;  %1502 = vrot.lane.b32.xlu0 %v1473_v8, %s2130_s0 }
0x18e1   :  { %v2082_v28 = vpop.eup %2081 }
0x18e2   :  { %1476 = vrot.lane.b32.xlu1 %v2082_v28, %s2127_s18 }
0x18e5   :  { %v502_v37 = vpop.permute.xlu0 %501 }
0x18e6   :  { %1321 = vperm.xlu1 %1923, %v1319_v27   ;;  %vm503_vm1 = vcmp.eq.s32.totalorder %v502_v37, 1 }
0x18e9   :  { %v830_v30 = vpop.permute.xlu0 %829 }
0x18ea   :  { %337 = vrot.lane.b32.xlu1 %v161_v58, %s2130_s0  ;;  %vm831_vm3 = vcmp.eq.s32.totalorder %v830_v30, 1 }
0x18ed   :  { %v1158_v40 = vpop.permute.xlu0 %1157 }
0x18ee   :  { %vm1159_vm5 = vcmp.eq.s32.totalorder %v1158_v40, 1 }
0x18f1   :  { %v1486_v31 = vpop.permute.xlu0 %1485 }
0x18f2   :  { %vm1487_vm7 = vcmp.eq.s32.totalorder %v1486_v31, 1 }
0x18f5   :  { %v1493_v32 = vpop.permute.xlu0 %1492 }
0x18f6   :  { %1495 = vst.msk [vmem:[#allocation5] sm:$0xf] %vm132_vm0, %v1493_v32 }
0x1949   :  { %v1503_v38 = vpop.permute.xlu0 %1502 }
0x194a   :  { %1505 = vst.msk [vmem:[#allocation7] sm:$0xf] %vm132_vm0, %v1503_v38 }
0x1954   :  { %v1477_v42 = vpop.permute.xlu1 %1476 }
0x1955   :  { %v1479_v43 = vmul.f32 %v1477_v42, %v1462_v16 }
0x1957   :  { %2083 = vtanh.f32 %v1479_v43 }
0x1961   :  { %v2084_v44 = vpop.eup %2083 }
0x1962   :  { %1497 = vrot.lane.b32.xlu1 %v2084_v44, %s2128_s19 }
0x1965   :  { %v1322_v45 = vpop.permute.xlu1 %1321 }
0x1966   :  { %vm1323_vm6 = vcmp.eq.s32.totalorder %v1322_v45, 1 }
0x1969   :  { %v338_v46 = vpop.permute.xlu1 %337 }
0x196a   :  { %v340_v47 = vsel %vm335_vm15, %v2311_v39, %v338_v46 }
0x196b   :  { %v504_v48 = vsel %vm503_vm1, %v2358_v29, %v340_v47 }
0x196c   :  { %v668_v49 = vsel %vm667_vm2, %v2405_v21, %v504_v48 }
0x196d   :  { %v832_v50 = vsel %vm831_vm3, %v2452_v17, %v668_v49 }
0x196e   :  { %v996_v51 = vsel %vm995_vm4, %v2498_v9, %v832_v50 }
0x196f   :  { %v1160_v52 = vsel %vm1159_vm5, %v2544_v62, %v996_v51 }
0x1970   :  { %v1324_v53 = vsel %vm1323_vm6, %v2580_v54, %v1160_v52 }
0x1971   :  { %v1488_v55 = vsel %vm1487_vm7, %v2084_v44, %v1324_v53 }
0x1972   :  { %1507 = vrot.lane.b32.xlu1 %v1488_v55, %s2128_s19 }
0x19d4   :  { %v1498_v39 = vpop.permute.xlu1 %1497 }
0x19d5   :  { %1500 = vst.msk [vmem:[#allocation6] sm:$0xf] %vm132_vm0, %v1498_v39 }
0x19e4   :  { %v1508_v29 = vpop.permute.xlu1 %1507 }
0x19e5   :  { %1510 = vst.msk [vmem:[#allocation8] sm:$0xf] %vm132_vm0, %v1508_v29 }
0x19e6 PF:  { %1901 = vmatprep.subr.bf16.mxu0 %v2124_v6  ;;  %v2090_v21 = vld [vmem:[%s2645_s4] sm:$0xff]   ;;  %vm2131_vm8 = vmmov 0   ;;  %v2091_v17 = vld [vmem:[%s2645_s4 + $0x8] sm:$0xff]   ;;  %vm1539_vm0 = vcmask 261120   ;;  %vm1583_vm9 = vcmask 60416   ;;  %s2132_s4 = smov [#allocation10]  }
0x19e7   :  { %1905 = vmatprep.mubr.msk.bf16.mxu0 %vm2131_vm8, %v2124_v6  ;;  %1902 = vmatpush3.bf16.msra.mxu0 %v2090_v21  ;;  %v1670_v54 = vld [vmem:[%s2646_s5] ss:$0 sm:$0xff]  ;;  %s1604_s5 = sshll.u32 %s2132_s4, 4  ;;  %s1605_s5 = int_to_ptr.vmem [resolvable:$true] %s1604_s5 }
0x19e8   :  { %1903 = vmatprep.subr.bf16.mxu0 %v2124_v6  ;;  %s2096_s19 = scalar_lea.vmem %s1605_s5, 64  ;;  %p2101_p2 = scmp.lt.s32.totalorder %s1605_s5, %s1605_s5 }
0x19e9   :  { %p2097_p1 = scmp.ne.s32.totalorder %s1605_s5, %s2096_s19  ;;  %p2102_p3 = scmp.lt.s32.totalorder %s2096_s19, %s2096_s19 }
0x19eb   :  { %1904 = vmatpush3.bf16.msra.mxu0 %v2091_v17  ;;  %p2103_p4 = por %p2102_p3, %p2101_p2 }
0x19ec   :  { %v1518_v9 = vld [vmem:[#allocation8] sm:$0xf] }
0x19ed   :  { %v1519_v62 = vpack.c.bf16 %v1518_v9, %v1518_v9  ;;  %p2104_p5 = pnand %p2103_p4, %p2097_p1 }
0x19ef   :  { %1906 = vmatmul.mubr.msk.bf16.vlgmr.msra.gmra.mrb[0].mxu0 %vm1539_vm0, %v1519_v62 }
0x1ac2   :  { %v1577_v56 = vpop.f32.mrb[0].mxu0 }
0x1ac3   :  { %v1578_v57 = vadd.f32 %v1670_v54, %v1577_v56  ;;  %v1907_v59 = vpop.f32.mrb[1].mxu0 }
0x1ac4   :  { %v1580_v60 = vpop.f32.mrb[2].mxu0 }
0x1ac5   :  { %v1908_v61 = vpop.f32.mrb[3].mxu0  ;;  %v1584_v63 = vsel %vm1583_vm9, %v1578_v57, -inf }
0x1ac6   :  { %1585 = vmax.xlane.f32.xlu0 %v1584_v63 }
0x1b53   :  { %v1586_v0 = vpop.xlane.xlu0 %1585 }
0x1b54   :  { %v1587_v2 = vsub.f32 %v1578_v57, %v1586_v0 }
0x1b56   :  { %v1588_v6 = vmul.f32 1.442695, %v1587_v2 }
0x1b58   :  { %2092 = vpow2.f32 %v1588_v6 }
0x1b62   :  { %v2093_v3 = vpop.eup %2092 }
0x1b63   :  { %v1590_v5 = vsel %vm1583_vm9, %v2093_v3, 0.0 }
0x1b64   :  { %1591 = vadd.xlane.f32.xlu0 %v1590_v5 }
0x1bf1   :  { %v1592_v1 = vpop.xlane.xlu0 %1591 }
0x1bf2   :  { %2094 = vlog2.f32 %v1592_v1 }
0x1bfc   :  { %v2095_v11 = vpop.eup %2094 }
0x1bfd   :  { %v1594_v12 = vmul.f32 0.6931472, %v2095_v11 }
0x1bff   :  { %v1595_v4 = vadd.f32 %v1594_v12, %v1586_v0 }
0x1c01   :  { %v1596_v14 = vsub.f32 %v1578_v57, %v1595_v4 }
0x1c03   :  { %1597 = vst.msk [vmem:[#allocation10] sm:$0xf] %vm1583_vm9, %v1596_v14 }
0x1c04   :  { %2107 = shalt.err (!%p2104_p5)
}
0x1c05   :  { %s2108_s22 = scalar_lea.hbm %s2649_s8, 64 }
0x1c06   :  { %p2109_p6 = scmp.ne.s32.totalorder %s2649_s8, %s2108_s22  ;;  %p2112_p7 = scmp.lt.u32.totalorder %s2108_s22, %s2649_s8 }
0x1c08   :  { %p2114_p8 = pnand %p2112_p7, %p2109_p6 }
0x1c0a   :  { %2117 = shalt.err (!%p2114_p8)
}
0x1c0b   :  { %1607 = dma.vmem_to_hbm [thread:$0]  %s1605_s5, 64, %s2649_s8, [#allocation11]  }
0x1c0c   :  { %2122 = dma.done.wait [#allocation11], 64  }
0x1c0d   :  { %2123 = vsyncadd [#allocation11], 4294967232 }
0x1c0e   :  { %1611 = vsyncpa [#allocation11], 1 }

</bundles_post_ra>
